<compile_context>
chip_gen: v5e
topology: v5e:2x2
jax: 0.10.0
libtpu: 0.0.40
codegen_flags: <defaults>
</compile_context>

<pallas_src>
import functools
import math

import jax
import jax.numpy as jnp
from jax import lax
from jax.experimental import pallas as pl
from jax.experimental.pallas import tpu as pltpu

LN_EPS = 1e-5
MASKED_BIAS = -10000.0


def _layernorm(h, g, b):
    # matches torch.nn.LayerNorm (biased variance, eps=1e-5); f32 math
    mu = jnp.mean(h, axis=-1, keepdims=True)
    var = jnp.mean((h - mu) ** 2, axis=-1, keepdims=True)
    return (h - mu) * lax.rsqrt(var + LN_EPS) * g + b


def _gelu_tanh(x):
    c = math.sqrt(2.0 / math.pi)
    return 0.5 * x * (1.0 + jnp.tanh(c * (x + 0.044715 * x * x * x)))


def gpt2_block_kernel(num_heads, tq,
                      x_ref,
                      ln1g_ref, ln1b_ref,
                      w_attn_ref, b_attn_ref,
                      w_proj_ref, b_proj_ref,
                      ln2g_ref, ln2b_ref,
                      w_fc_ref, b_fc_ref,
                      w_out_ref, b_out_ref,
                      o_ref,
                      q_sc, k_sc, v_sc,        # (H, T, Dh) head-major q/k/v (MXU dtype)
                      m_sc, l_sc, acc_sc):     # online-softmax running stats (f32)
    T, C = x_ref.shape[1], x_ref.shape[2]
    H = num_heads
    Dh = C // H
    TQ = tq
    n_qt = T // TQ
    mxu_dtype = w_attn_ref.dtype               # bf16 (or f32) at the MXU boundary
    scale = 1.0 / math.sqrt(float(Dh))

    # ---- prologue: ln_1 + c_attn over the full sequence (one full-depth MXU matmul) ----
    x_full = x_ref[0].astype(jnp.float32)                                   # (T, C)
    h1 = _layernorm(x_full, ln1g_ref[...], ln1b_ref[...])
    qkv = jnp.dot(h1.astype(mxu_dtype), w_attn_ref[...],
                  preferred_element_type=jnp.float32) + b_attn_ref[...]     # (T, 3C) f32

    # contiguous C-wide slices (lane-aligned), then one reshape + one transpose per tensor
    q = qkv[:, 0 * C:1 * C] * scale            # fold 1/sqrt(Dh) into q (f32, before downcast)
    k = qkv[:, 1 * C:2 * C]
    v = qkv[:, 2 * C:3 * C]
    q_sc[...] = jnp.transpose(q.reshape(T, H, Dh), (1, 0, 2)).astype(mxu_dtype)
    k_sc[...] = jnp.transpose(k.reshape(T, H, Dh), (1, 0, 2)).astype(mxu_dtype)
    v_sc[...] = jnp.transpose(v.reshape(T, H, Dh), (1, 0, 2)).astype(mxu_dtype)

    # ---- query-tile loop: flash-style attention + residual + ln_2 + MLP per tile ----
    @pl.loop(0, n_qt)
    def _(qt):
        q_start = pl.multiple_of(qt * TQ, TQ)
        q_tile = q_sc[:, pl.ds(q_start, TQ), :]                             # (H, TQ, Dh)
        row = q_start + lax.broadcasted_iota(jnp.int32, (TQ, TQ), 0)

        m_sc[...] = jnp.full(m_sc.shape, -jnp.inf, jnp.float32)
        l_sc[...] = jnp.zeros(l_sc.shape, jnp.float32)
        acc_sc[...] = jnp.zeros(acc_sc.shape, jnp.float32)

        # causal block skipping: only kv tiles <= qt are visited at all
        @pl.loop(0, qt + 1)
        def _(kv):
            kv_start = pl.multiple_of(kv * TQ, TQ)
            k_tile = k_sc[:, pl.ds(kv_start, TQ), :]
            v_tile = v_sc[:, pl.ds(kv_start, TQ), :]

            s = jnp.einsum('hqd,hkd->hqk', q_tile, k_tile,
                           preferred_element_type=jnp.float32)              # (H, TQ, TQ)
            col = kv_start + lax.broadcasted_iota(jnp.int32, (TQ, TQ), 1)
            # off-diagonal (kv < qt) blocks are fully unmasked, so this select is a no-op
            # there; only the diagonal block actually gets masked entries.
            s = jnp.where((col <= row)[None, :, :], s, jnp.float32(MASKED_BIAS))

            m_prev = m_sc[...]
            m_new = jnp.maximum(m_prev, jnp.max(s, axis=-1, keepdims=True))
            alpha = jnp.exp(m_prev - m_new)
            p = jnp.exp(s - m_new)
            l_sc[...] = alpha * l_sc[...] + jnp.sum(p, axis=-1, keepdims=True)
            acc_sc[...] = alpha * acc_sc[...] + jnp.einsum(
                'hqk,hkd->hqd', p.astype(mxu_dtype), v_tile,
                preferred_element_type=jnp.float32)
            m_sc[...] = m_new

        attn = acc_sc[...] / l_sc[...]                                      # exact normalizer
        merged = jnp.transpose(attn, (1, 0, 2)).reshape(TQ, C)              # merge heads
        a = jnp.dot(merged.astype(mxu_dtype), w_proj_ref[...],              # full K=C c_proj
                    preferred_element_type=jnp.float32) + b_proj_ref[...]

        x_tile = x_ref[0, pl.ds(q_start, TQ), :].astype(jnp.float32)
        hidden = x_tile + a                        # attn/resid dropout = identity

        h2 = _layernorm(hidden, ln2g_ref[...], ln2b_ref[...])
        mfc = jnp.dot(h2.astype(mxu_dtype), w_fc_ref[...],
                      preferred_element_type=jnp.float32) + b_fc_ref[...]
        mfc = _gelu_tanh(mfc)                      # f32 GELU (EUP tanh)
        mo = jnp.dot(mfc.astype(mxu_dtype), w_out_ref[...],
                     preferred_element_type=jnp.float32) + b_out_ref[...]
        # mlp dropout is identity at inference

        o_ref[0, pl.ds(q_start, TQ), :] = (hidden + mo).astype(o_ref.dtype)


def gpt2_block(x, params, num_heads, *, matmul_dtype=jnp.bfloat16, tq=None):
    B, T, C = x.shape
    H = num_heads
    assert C % H == 0
    Dh = C // H
    if tq is None:
        tq = 128 if T % 128 == 0 else T
    assert T % tq == 0

    md = jnp.dtype(matmul_dtype)
    # matmul weights at the MXU dtype; biases / LN params stay f32 (added elementwise in f32)
    weights = [
        params["ln1_g"].astype(jnp.float32), params["ln1_b"].astype(jnp.float32),
        params["w_attn"].astype(md), params["b_attn"].astype(jnp.float32),
        params["w_proj"].astype(md), params["b_proj"].astype(jnp.float32),
        params["ln2_g"].astype(jnp.float32), params["ln2_b"].astype(jnp.float32),
        params["w_fc"].astype(md), params["b_fc"].astype(jnp.float32),
        params["w_out"].astype(md), params["b_out"].astype(jnp.float32),
    ]
    # Constant weights: whole array resident in VMEM, single-buffered (no per-step DMA).
    weight_spec = pl.BlockSpec(memory_space=pltpu.MemorySpace.VMEM)

    # ---- VMEM budget (weights single-buffered — no 2x; no 64 MiB hard cap) ----
    f4 = 4
    itemsize_x = jnp.dtype(x.dtype).itemsize
    weight_bytes = sum(int(w.size) * jnp.dtype(w.dtype).itemsize for w in weights)
    act_bytes = 2 * 2 * T * C * itemsize_x                 # double-buffered (1,T,C) in + out
    head_scratch = 3 * T * C * md.itemsize                 # q/k/v head-major scratch
    olsm_scratch = f4 * (2 * H * tq * 128 + H * tq * max(Dh, 128))   # lane-padded stats
    prologue_tmp = f4 * (T * 3 * C + 2 * T * C)            # qkv + h1 + x during prologue
    tile_tmp = f4 * (4 * H * tq * tq + 2 * H * tq * Dh + 3 * tq * 4 * C + 4 * tq * C)
    needed = (weight_bytes + act_bytes + head_scratch + olsm_scratch
              + max(prologue_tmp, tile_tmp) + (8 << 20))   # headroom for Mosaic scratch
    try:
        vmem_cap = int(pltpu.get_tpu_info().vmem_capacity_bytes)
    except Exception:
        vmem_cap = 128 << 20
    cap_eff = min(100 << 20, (vmem_cap * 7) // 8)          # v7x ~56 MiB, v5e/v6e 100 MiB
    vmem_limit = int(min(max(needed, 32 << 20), cap_eff))

    flops_per_b = (2 * T * C * 3 * C          # c_attn
                   + 2 * T * T * C            # QK^T + P@V (causal-halved)
                   + 2 * T * C * C            # c_proj
                   + 16 * T * C * C)          # MLP (two 4C matmuls)
    cost = pl.CostEstimate(
        flops=B * flops_per_b,
        transcendentals=B * (H * T * T // 2 + T * 4 * C),  # softmax exp + GELU tanh
        bytes_accessed=weight_bytes + 2 * B * T * C * itemsize_x,
    )

    scratch_shapes = [
        pltpu.VMEM((H, T, Dh), md),             # q (head-major, pre-scaled)
        pltpu.VMEM((H, T, Dh), md),             # k
        pltpu.VMEM((H, T, Dh), md),             # v
        pltpu.VMEM((H, tq, 1), jnp.float32),    # running max
        pltpu.VMEM((H, tq, 1), jnp.float32),    # running denominator
        pltpu.VMEM((H, tq, Dh), jnp.float32),   # running numerator
    ]

    kernel = functools.partial(gpt2_block_kernel, num_heads, tq)
    return pl.pallas_call(
        kernel,
        out_shape=jax.ShapeDtypeStruct((B, T, C), x.dtype),
        grid_spec=pltpu.PrefetchScalarGridSpec(
            num_scalar_prefetch=0,
            grid=(B,),
            in_specs=[pl.BlockSpec((1, T, C), lambda b: (b, 0, 0))]
                     + [weight_spec] * 12,
            out_specs=pl.BlockSpec((1, T, C), lambda b: (b, 0, 0)),
            scratch_shapes=scratch_shapes,
        ),
        compiler_params=pltpu.CompilerParams(
            dimension_semantics=("parallel",),
            vmem_limit_bytes=vmem_limit,
        ),
        cost_estimate=cost,
    )(x, *weights)
    # TODO(synk): for very small B on v7x (2 TCs), hoist the query-tile loop into a second
    # "parallel" grid axis (with K/V precomputed once) so both TensorCores stay busy.
    # TODO(synk): if VMEM is still tight on v7x at long context, stream w_fc/w_out through
    # BlockSpec tiles over the 4C dimension instead of keeping them fully resident.


# -------------------- pure-JAX reference (for verification) --------------------
def gpt2_block_ref(x, p, num_heads):
    B, T, C = x.shape
    H, Dh = num_heads, C // num_heads

    def ln(h, g, b):
        mu = jnp.mean(h, axis=-1, keepdims=True)
        var = jnp.mean((h - mu) ** 2, axis=-1, keepdims=True)
        return (h - mu) / jnp.sqrt(var + LN_EPS) * g + b

    h1 = ln(x, p["ln1_g"], p["ln1_b"])
    qkv = h1 @ p["w_attn"] + p["b_attn"]
    q, k, v = jnp.split(qkv, 3, axis=-1)
    q = q.reshape(B, T, H, Dh).transpose(0, 2, 1, 3)
    k = k.reshape(B, T, H, Dh).transpose(0, 2, 3, 1)
    v = v.reshape(B, T, H, Dh).transpose(0, 2, 1, 3)
    w = (q @ k) / math.sqrt(Dh)
    mask = jnp.tril(jnp.ones((T, T), dtype=bool))
    w = jnp.where(mask, w, MASKED_BIAS)
    w = jax.nn.softmax(w, axis=-1)
    a = (w @ v).transpose(0, 2, 1, 3).reshape(B, T, C)
    a = a @ p["w_proj"] + p["b_proj"]
    hidden = x + a
    h2 = ln(hidden, p["ln2_g"], p["ln2_b"])
    m = h2 @ p["w_fc"] + p["b_fc"]
    m = _gelu_tanh(m)
    m = m @ p["w_out"] + p["b_out"]
    return hidden + m


if __name__ == "__main__":
    B, T, C, H = 2, 8, 32, 4   # batch, seq (== num_positions), embed_dim, num_heads
    key = jax.random.PRNGKey(0)
    ks = jax.random.split(key, 6)

    params = {
        "ln1_g": jnp.ones((1, C), jnp.float32),
        "ln1_b": jnp.zeros((1, C), jnp.float32),
        "w_attn": 0.02 * jax.random.normal(ks[0], (C, 3 * C), jnp.float32),
        "b_attn": jnp.zeros((1, 3 * C), jnp.float32),
        "w_proj": 0.02 * jax.random.normal(ks[1], (C, C), jnp.float32),
        "b_proj": jnp.zeros((1, C), jnp.float32),
        "ln2_g": jnp.ones((1, C), jnp.float32),
        "ln2_b": jnp.zeros((1, C), jnp.float32),
        "w_fc": 0.02 * jax.random.normal(ks[2], (C, 4 * C), jnp.float32),
        "b_fc": jnp.zeros((1, 4 * C), jnp.float32),
        "w_out": 0.02 * jax.random.normal(ks[3], (4 * C, C), jnp.float32),
        "b_out": jnp.zeros((1, C), jnp.float32),
    }

    x = jax.random.normal(ks[4], (B, T, C), jnp.float32)

    out_bf16 = jax.block_until_ready(gpt2_block(x, params, H))                       # default bf16 MXU path
    out_f32 = jax.block_until_ready(gpt2_block(x, params, H, matmul_dtype=jnp.float32))

    ref = gpt2_block_ref(x, params, H)
    assert out_bf16.shape == (B, T, C)

    # f32-matmul path should match the reference tightly
    err_f32 = float(jnp.max(jnp.abs(out_f32 - ref)))
    assert jnp.allclose(out_f32, ref, atol=1e-4, rtol=1e-4), err_f32
    # bf16-matmul / f32-accumulate path: looser tolerance for the MXU downcast
    err_bf16 = float(jnp.max(jnp.abs(out_bf16 - ref)))
    assert jnp.allclose(out_bf16, ref, atol=2e-2, rtol=2e-2), err_bf16

    print("KERNEL_OK")
</pallas_src>

<mosaic_0001>
module attributes {stable_mosaic.version = 11 : i64} {
  func.func @gpt2_block_kernel(%arg0: i32, %arg1: memref<1x8x32xf32, #tpu.memory_space<vmem>>, %arg2: memref<1x32xf32, #tpu.memory_space<vmem>>, %arg3: memref<1x32xf32, #tpu.memory_space<vmem>>, %arg4: memref<32x96xbf16, #tpu.memory_space<vmem>>, %arg5: memref<1x96xf32, #tpu.memory_space<vmem>>, %arg6: memref<32x32xbf16, #tpu.memory_space<vmem>>, %arg7: memref<1x32xf32, #tpu.memory_space<vmem>>, %arg8: memref<1x32xf32, #tpu.memory_space<vmem>>, %arg9: memref<1x32xf32, #tpu.memory_space<vmem>>, %arg10: memref<32x128xbf16, #tpu.memory_space<vmem>>, %arg11: memref<1x128xf32, #tpu.memory_space<vmem>>, %arg12: memref<128x32xbf16, #tpu.memory_space<vmem>>, %arg13: memref<1x32xf32, #tpu.memory_space<vmem>>, %arg14: memref<1x8x32xf32, #tpu.memory_space<vmem>>, %arg15: memref<4x8x8xbf16, #tpu.memory_space<vmem>>, %arg16: memref<4x8x8xbf16, #tpu.memory_space<vmem>>, %arg17: memref<4x8x8xbf16, #tpu.memory_space<vmem>>, %arg18: memref<4x8x1xf32, #tpu.memory_space<vmem>>, %arg19: memref<4x8x1xf32, #tpu.memory_space<vmem>>, %arg20: memref<4x8x8xf32, #tpu.memory_space<vmem>>) attributes {dimension_semantics = [#tpu.dimension_semantics<parallel>], iteration_bounds = array<i64: 2>, scalar_prefetch = 0 : i64, scratch_operands = 6 : i64, tpu.core_type = #tpu.core_type<tc>, window_params = [{transform_indices = @transform_0, window_bounds = array<i64: 1, 8, 32>}, {pipeline_mode = #tpu.pipeline_mode<synchronous>, transform_indices = @transform_1, window_bounds = array<i64: 1, 32>}, {pipeline_mode = #tpu.pipeline_mode<synchronous>, transform_indices = @transform_2, window_bounds = array<i64: 1, 32>}, {pipeline_mode = #tpu.pipeline_mode<synchronous>, transform_indices = @transform_3, window_bounds = array<i64: 32, 96>}, {pipeline_mode = #tpu.pipeline_mode<synchronous>, transform_indices = @transform_4, window_bounds = array<i64: 1, 96>}, {pipeline_mode = #tpu.pipeline_mode<synchronous>, transform_indices = @transform_5, window_bounds = array<i64: 32, 32>}, {pipeline_mode = #tpu.pipeline_mode<synchronous>, transform_indices = @transform_6, window_bounds = array<i64: 1, 32>}, {pipeline_mode = #tpu.pipeline_mode<synchronous>, transform_indices = @transform_7, window_bounds = array<i64: 1, 32>}, {pipeline_mode = #tpu.pipeline_mode<synchronous>, transform_indices = @transform_8, window_bounds = array<i64: 1, 32>}, {pipeline_mode = #tpu.pipeline_mode<synchronous>, transform_indices = @transform_9, window_bounds = array<i64: 32, 128>}, {pipeline_mode = #tpu.pipeline_mode<synchronous>, transform_indices = @transform_10, window_bounds = array<i64: 1, 128>}, {pipeline_mode = #tpu.pipeline_mode<synchronous>, transform_indices = @transform_11, window_bounds = array<i64: 128, 32>}, {pipeline_mode = #tpu.pipeline_mode<synchronous>, transform_indices = @transform_12, window_bounds = array<i64: 1, 32>}, {transform_indices = @transform_13, window_bounds = array<i64: 1, 8, 32>}]} {
    %c0 = arith.constant 0 : index
    %c0_0 = arith.constant 0 : index
    %c0_1 = arith.constant 0 : index
    %0 = vector.load %arg1[%c0, %c0_0, %c0_1] : memref<1x8x32xf32, #tpu.memory_space<vmem>>, vector<1x8x32xf32>
    %1 = vector.shape_cast %0 : vector<1x8x32xf32> to vector<8x32xf32>
    %c0_2 = arith.constant 0 : index
    %c0_3 = arith.constant 0 : index
    %2 = vector.load %arg2[%c0_2, %c0_3] : memref<1x32xf32, #tpu.memory_space<vmem>>, vector<1x32xf32>
    %c0_4 = arith.constant 0 : index
    %c0_5 = arith.constant 0 : index
    %3 = vector.load %arg3[%c0_4, %c0_5] : memref<1x32xf32, #tpu.memory_space<vmem>>, vector<1x32xf32>
    %cst = arith.constant dense<0.000000e+00> : vector<8xf32>
    %4 = vector.multi_reduction <add>, %1, %cst [1] : vector<8x32xf32> to vector<8xf32>
    %5 = vector.shape_cast %4 : vector<8xf32> to vector<8x1xf32>
    %cst_6 = arith.constant 3.200000e+01 : f32
    %6 = vector.broadcast %cst_6 : f32 to vector<8x1xf32>
    %7 = arith.divf %5, %6 : vector<8x1xf32>
    %8 = vector.broadcast %7 : vector<8x1xf32> to vector<8x32xf32>
    %9 = arith.subf %1, %8 : vector<8x32xf32>
    %10 = arith.mulf %9, %9 : vector<8x32xf32>
    %cst_7 = arith.constant dense<0.000000e+00> : vector<8xf32>
    %11 = vector.multi_reduction <add>, %10, %cst_7 [1] : vector<8x32xf32> to vector<8xf32>
    %12 = vector.shape_cast %11 : vector<8xf32> to vector<8x1xf32>
    %cst_8 = arith.constant 3.200000e+01 : f32
    %13 = vector.broadcast %cst_8 : f32 to vector<8x1xf32>
    %14 = arith.divf %12, %13 : vector<8x1xf32>
    %15 = vector.broadcast %7 : vector<8x1xf32> to vector<8x32xf32>
    %16 = arith.subf %1, %15 : vector<8x32xf32>
    %cst_9 = arith.constant 9.99999974E-6 : f32
    %17 = vector.broadcast %cst_9 : f32 to vector<8x1xf32>
    %18 = arith.addf %14, %17 : vector<8x1xf32>
    %19 = math.rsqrt %18 : vector<8x1xf32>
    %20 = vector.broadcast %19 : vector<8x1xf32> to vector<8x32xf32>
    %21 = arith.mulf %16, %20 : vector<8x32xf32>
    %22 = vector.broadcast %2 : vector<1x32xf32> to vector<8x32xf32>
    %23 = arith.mulf %21, %22 : vector<8x32xf32>
    %24 = vector.broadcast %3 : vector<1x32xf32> to vector<8x32xf32>
    %25 = arith.addf %23, %24 : vector<8x32xf32>
    %26 = arith.truncf %25 : vector<8x32xf32> to vector<8x32xbf16>
    %c0_10 = arith.constant 0 : index
    %c0_11 = arith.constant 0 : index
    %27 = vector.load %arg4[%c0_10, %c0_11] : memref<32x96xbf16, #tpu.memory_space<vmem>>, vector<32x96xbf16>
    %cst_12 = arith.constant dense<0.000000e+00> : vector<8x96xf32>
    %28 = tpu.matmul %26, %27, %cst_12 {dimension_numbers = #tpu.dot_dimension_numbers<[1], [0], [0], [1], [0, 0, 1, 1], [], []>} : vector<8x32xbf16>, vector<32x96xbf16>, vector<8x96xf32> -> vector<8x96xf32>
    %c0_13 = arith.constant 0 : index
    %c0_14 = arith.constant 0 : index
    %29 = vector.load %arg5[%c0_13, %c0_14] : memref<1x96xf32, #tpu.memory_space<vmem>>, vector<1x96xf32>
    %30 = vector.broadcast %29 : vector<1x96xf32> to vector<8x96xf32>
    %31 = arith.addf %28, %30 : vector<8x96xf32>
    %32 = vector.extract_strided_slice %31 {offsets = [0, 0], sizes = [8, 32], strides = [1, 1]} : vector<8x96xf32> to vector<8x32xf32>
    %cst_15 = arith.constant 0.353553385 : f32
    %33 = vector.broadcast %cst_15 : f32 to vector<8x32xf32>
    %34 = arith.mulf %32, %33 : vector<8x32xf32>
    %35 = vector.extract_strided_slice %31 {offsets = [0, 32], sizes = [8, 32], strides = [1, 1]} : vector<8x96xf32> to vector<8x32xf32>
    %36 = vector.extract_strided_slice %31 {offsets = [0, 64], sizes = [8, 32], strides = [1, 1]} : vector<8x96xf32> to vector<8x32xf32>
    %37 = vector.shape_cast %34 : vector<8x32xf32> to vector<8x4x8xf32>
    %38 = tpu.transpose %37, [1, 0, 2] : vector<8x4x8xf32> -> vector<4x8x8xf32>
    %39 = arith.truncf %38 : vector<4x8x8xf32> to vector<4x8x8xbf16>
    %c0_16 = arith.constant 0 : index
    %c0_17 = arith.constant 0 : index
    %c0_18 = arith.constant 0 : index
    %40 = vector.load %arg15[%c0_16, %c0_17, %c0_18] : memref<4x8x8xbf16, #tpu.memory_space<vmem>>, vector<4x8x8xbf16>
    tpu.vector_store %arg15[%c0_16, %c0_17, %c0_18], %39 {strides = array<i32>} : memref<4x8x8xbf16, #tpu.memory_space<vmem>>, vector<4x8x8xbf16>,
    %41 = vector.shape_cast %35 : vector<8x32xf32> to vector<8x4x8xf32>
    %42 = tpu.transpose %41, [1, 0, 2] : vector<8x4x8xf32> -> vector<4x8x8xf32>
    %43 = arith.truncf %42 : vector<4x8x8xf32> to vector<4x8x8xbf16>
    %c0_19 = arith.constant 0 : index
    %c0_20 = arith.constant 0 : index
    %c0_21 = arith.constant 0 : index
    %44 = vector.load %arg16[%c0_19, %c0_20, %c0_21] : memref<4x8x8xbf16, #tpu.memory_space<vmem>>, vector<4x8x8xbf16>
    tpu.vector_store %arg16[%c0_19, %c0_20, %c0_21], %43 {strides = array<i32>} : memref<4x8x8xbf16, #tpu.memory_space<vmem>>, vector<4x8x8xbf16>,
    %45 = vector.shape_cast %36 : vector<8x32xf32> to vector<8x4x8xf32>
    %46 = tpu.transpose %45, [1, 0, 2] : vector<8x4x8xf32> -> vector<4x8x8xf32>
    %47 = arith.truncf %46 : vector<4x8x8xf32> to vector<4x8x8xbf16>
    %c0_22 = arith.constant 0 : index
    %c0_23 = arith.constant 0 : index
    %c0_24 = arith.constant 0 : index
    %48 = vector.load %arg17[%c0_22, %c0_23, %c0_24] : memref<4x8x8xbf16, #tpu.memory_space<vmem>>, vector<4x8x8xbf16>
    tpu.vector_store %arg17[%c0_22, %c0_23, %c0_24], %47 {strides = array<i32>} : memref<4x8x8xbf16, #tpu.memory_space<vmem>>, vector<4x8x8xbf16>,
    %c0_i32 = arith.constant 0 : i32
    %c1_i32 = arith.constant 1 : i32
    %49 = arith.muli %c0_i32, %c1_i32 : i32
    %c0_i32_25 = arith.constant 0 : i32
    %50 = arith.addi %c0_i32_25, %49 : i32
    %c8_i32 = arith.constant 8 : i32
    %51 = arith.muli %50, %c8_i32 : i32
    %52 = tpu.assume_multiple %51, 8 : i32
    %c0_26 = arith.constant 0 : index
    %53 = arith.index_cast %52 : i32 to index
    %c0_27 = arith.constant 0 : index
    %54 = vector.load %arg15[%c0_26, %53, %c0_27] : memref<4x8x8xbf16, #tpu.memory_space<vmem>>, vector<4x8x8xbf16>
    %55 = tpu.iota {dimensions = array<i32: 0>} : vector<8x8xi32>
    %56 = vector.broadcast %52 : i32 to vector<8x8xi32>
    %57 = arith.addi %56, %55 : vector<8x8xi32>
    %cst_28 = arith.constant 0xFF800000 : f32
    %58 = vector.broadcast %cst_28 : f32 to vector<4x8x1xf32>
    %c0_29 = arith.constant 0 : index
    %c0_30 = arith.constant 0 : index
    %c0_31 = arith.constant 0 : index
    %59 = vector.load %arg18[%c0_29, %c0_30, %c0_31] : memref<4x8x1xf32, #tpu.memory_space<vmem>>, vector<4x8x1xf32>
    tpu.vector_store %arg18[%c0_29, %c0_30, %c0_31], %58 {strides = array<i32>} : memref<4x8x1xf32, #tpu.memory_space<vmem>>, vector<4x8x1xf32>,
    %cst_32 = arith.constant 0.000000e+00 : f32
    %60 = vector.broadcast %cst_32 : f32 to vector<4x8x1xf32>
    %c0_33 = arith.constant 0 : index
    %c0_34 = arith.constant 0 : index
    %c0_35 = arith.constant 0 : index
    %61 = vector.load %arg19[%c0_33, %c0_34, %c0_35] : memref<4x8x1xf32, #tpu.memory_space<vmem>>, vector<4x8x1xf32>
    tpu.vector_store %arg19[%c0_33, %c0_34, %c0_35], %60 {strides = array<i32>} : memref<4x8x1xf32, #tpu.memory_space<vmem>>, vector<4x8x1xf32>,
    %cst_36 = arith.constant 0.000000e+00 : f32
    %62 = vector.broadcast %cst_36 : f32 to vector<4x8x8xf32>
    %c0_37 = arith.constant 0 : index
    %c0_38 = arith.constant 0 : index
    %c0_39 = arith.constant 0 : index
    %63 = vector.load %arg20[%c0_37, %c0_38, %c0_39] : memref<4x8x8xf32, #tpu.memory_space<vmem>>, vector<4x8x8xf32>
    tpu.vector_store %arg20[%c0_37, %c0_38, %c0_39], %62 {strides = array<i32>} : memref<4x8x8xf32, #tpu.memory_space<vmem>>, vector<4x8x8xf32>,
    %c1_i32_40 = arith.constant 1 : i32
    %64 = arith.addi %50, %c1_i32_40 : i32
    %c0_i32_41 = arith.constant 0 : i32
    %65 = arith.subi %64, %c0_i32_41 : i32
    %c1_i32_42 = arith.constant 1 : i32
    %c1_i32_43 = arith.constant 1 : i32
    %66 = arith.subi %c1_i32_42, %c1_i32_43 : i32
    %67 = arith.addi %65, %66 : i32
    %c1_i32_44 = arith.constant 1 : i32
    %68 = arith.divsi %67, %c1_i32_44 : i32
    %c1_i32_45 = arith.constant 1 : i32
    %c0_i32_46 = arith.constant 0 : i32
    %c0_i32_47 = arith.constant 0 : i32
    %69 = arith.subi %68, %c0_i32_47 : i32
    %70 = arith.addi %c0_i32_47, %69 : i32
    %c1_i32_48 = arith.constant 1 : i32
    scf.for %arg21 = %c0_i32_47 to %70 step %c1_i32_48  : i32 {
      %141 = arith.muli %arg21, %c1_i32_45 : i32
      %142 = arith.addi %c0_i32_46, %141 : i32
      %c8_i32_88 = arith.constant 8 : i32
      %143 = arith.muli %142, %c8_i32_88 : i32
      %144 = tpu.assume_multiple %143, 8 : i32
      %c0_89 = arith.constant 0 : index
      %145 = arith.index_cast %144 : i32 to index
      %c0_90 = arith.constant 0 : index
      %146 = vector.load %arg16[%c0_89, %145, %c0_90] : memref<4x8x8xbf16, #tpu.memory_space<vmem>>, vector<4x8x8xbf16>
      %c0_91 = arith.constant 0 : index
      %147 = arith.index_cast %144 : i32 to index
      %c0_92 = arith.constant 0 : index
      %148 = vector.load %arg17[%c0_91, %147, %c0_92] : memref<4x8x8xbf16, #tpu.memory_space<vmem>>, vector<4x8x8xbf16>
      "tpu.trace_start"() <{level = 10 : i32, message = "hqd,hkd->hqk"}> : () -> ()
      %cst_93 = arith.constant dense<0.000000e+00> : vector<4x8x8xf32>
      %149 = tpu.matmul %54, %146, %cst_93 {dimension_numbers = #tpu.dot_dimension_numbers<[2], [2], [1], [1], [0, 0, 0, 1, 1, 1], [0], [0]>} : vector<4x8x8xbf16>, vector<4x8x8xbf16>, vector<4x8x8xf32> -> vector<4x8x8xf32>
      "tpu.trace_stop"() : () -> ()
      %150 = tpu.iota {dimensions = array<i32: 1>} : vector<8x8xi32>
      %151 = vector.broadcast %144 : i32 to vector<8x8xi32>
      %152 = arith.addi %151, %150 : vector<8x8xi32>
      %153 = arith.cmpi sle, %152, %57 : vector<8x8xi32>
      %154 = vector.shape_cast %153 : vector<8x8xi1> to vector<1x8x8xi1>
      %cst_94 = arith.constant -1.000000e+04 : f32
      %155 = vector.shape_cast %154 : vector<1x8x8xi1> to vector<1x8x8xi1>
      %156 = vector.broadcast %155 : vector<1x8x8xi1> to vector<4x8x8xi1>
      %157 = vector.broadcast %cst_94 : f32 to vector<4x8x8xf32>
      %158 = arith.select %156, %149, %157 : vector<4x8x8xi1>, vector<4x8x8xf32>
      %c0_95 = arith.constant 0 : index
      %c0_96 = arith.constant 0 : index
      %c0_97 = arith.constant 0 : index
      %159 = vector.load %arg18[%c0_95, %c0_96, %c0_97] : memref<4x8x1xf32, #tpu.memory_space<vmem>>, vector<4x8x1xf32>
      %cst_98 = arith.constant dense<0xFF800000> : vector<4x8xf32>
      %160 = vector.multi_reduction <maximumf>, %158, %cst_98 [2] : vector<4x8x8xf32> to vector<4x8xf32>
      %161 = vector.shape_cast %160 : vector<4x8xf32> to vector<4x8x1xf32>
      %162 = arith.maximumf %159, %161 : vector<4x8x1xf32>
      %163 = arith.subf %159, %162 : vector<4x8x1xf32>
      %164 = math.exp %163 : vector<4x8x1xf32>
      %165 = vector.broadcast %162 : vector<4x8x1xf32> to vector<4x8x8xf32>
      %166 = arith.subf %158, %165 : vector<4x8x8xf32>
      %167 = math.exp %166 : vector<4x8x8xf32>
      %c0_99 = arith.constant 0 : index
      %c0_100 = arith.constant 0 : index
      %c0_101 = arith.constant 0 : index
      %168 = vector.load %arg19[%c0_99, %c0_100, %c0_101] : memref<4x8x1xf32, #tpu.memory_space<vmem>>, vector<4x8x1xf32>
      %169 = arith.mulf %164, %168 : vector<4x8x1xf32>
      %cst_102 = arith.constant dense<0.000000e+00> : vector<4x8xf32>
      %170 = vector.multi_reduction <add>, %167, %cst_102 [2] : vector<4x8x8xf32> to vector<4x8xf32>
      %171 = vector.shape_cast %170 : vector<4x8xf32> to vector<4x8x1xf32>
      %172 = arith.addf %169, %171 : vector<4x8x1xf32>
      %c0_103 = arith.constant 0 : index
      %c0_104 = arith.constant 0 : index
      %c0_105 = arith.constant 0 : index
      %173 = vector.load %arg19[%c0_103, %c0_104, %c0_105] : memref<4x8x1xf32, #tpu.memory_space<vmem>>, vector<4x8x1xf32>
      tpu.vector_store %arg19[%c0_103, %c0_104, %c0_105], %172 {strides = array<i32>} : memref<4x8x1xf32, #tpu.memory_space<vmem>>, vector<4x8x1xf32>,
      %c0_106 = arith.constant 0 : index
      %c0_107 = arith.constant 0 : index
      %c0_108 = arith.constant 0 : index
      %174 = vector.load %arg20[%c0_106, %c0_107, %c0_108] : memref<4x8x8xf32, #tpu.memory_space<vmem>>, vector<4x8x8xf32>
      %175 = vector.broadcast %164 : vector<4x8x1xf32> to vector<4x8x8xf32>
      %176 = arith.mulf %175, %174 : vector<4x8x8xf32>
      %177 = arith.truncf %167 : vector<4x8x8xf32> to vector<4x8x8xbf16>
      "tpu.trace_start"() <{level = 10 : i32, message = "hqk,hkd->hqd"}> : () -> ()
      %cst_109 = arith.constant dense<0.000000e+00> : vector<4x8x8xf32>
      %178 = tpu.matmul %177, %148, %cst_109 {dimension_numbers = #tpu.dot_dimension_numbers<[2], [1], [1], [2], [0, 0, 0, 1, 1, 2], [0], [0]>} : vector<4x8x8xbf16>, vector<4x8x8xbf16>, vector<4x8x8xf32> -> vector<4x8x8xf32>
      "tpu.trace_stop"() : () -> ()
      %179 = arith.addf %176, %178 : vector<4x8x8xf32>
      %c0_110 = arith.constant 0 : index
      %c0_111 = arith.constant 0 : index
      %c0_112 = arith.constant 0 : index
      %180 = vector.load %arg20[%c0_110, %c0_111, %c0_112] : memref<4x8x8xf32, #tpu.memory_space<vmem>>, vector<4x8x8xf32>
      tpu.vector_store %arg20[%c0_110, %c0_111, %c0_112], %179 {strides = array<i32>} : memref<4x8x8xf32, #tpu.memory_space<vmem>>, vector<4x8x8xf32>,
      %c0_113 = arith.constant 0 : index
      %c0_114 = arith.constant 0 : index
      %c0_115 = arith.constant 0 : index
      %181 = vector.load %arg18[%c0_113, %c0_114, %c0_115] : memref<4x8x1xf32, #tpu.memory_space<vmem>>, vector<4x8x1xf32>
      tpu.vector_store %arg18[%c0_113, %c0_114, %c0_115], %162 {strides = array<i32>} : memref<4x8x1xf32, #tpu.memory_space<vmem>>, vector<4x8x1xf32>,
    }
    %c0_49 = arith.constant 0 : index
    %c0_50 = arith.constant 0 : index
    %c0_51 = arith.constant 0 : index
    %71 = vector.load %arg20[%c0_49, %c0_50, %c0_51] : memref<4x8x8xf32, #tpu.memory_space<vmem>>, vector<4x8x8xf32>
    %c0_52 = arith.constant 0 : index
    %c0_53 = arith.constant 0 : index
    %c0_54 = arith.constant 0 : index
    %72 = vector.load %arg19[%c0_52, %c0_53, %c0_54] : memref<4x8x1xf32, #tpu.memory_space<vmem>>, vector<4x8x1xf32>
    %73 = vector.broadcast %72 : vector<4x8x1xf32> to vector<4x8x8xf32>
    %74 = arith.divf %71, %73 : vector<4x8x8xf32>
    %75 = tpu.transpose %74, [1, 0, 2] : vector<4x8x8xf32> -> vector<8x4x8xf32>
    %76 = vector.shape_cast %75 : vector<8x4x8xf32> to vector<8x32xf32>
    %77 = arith.truncf %76 : vector<8x32xf32> to vector<8x32xbf16>
    %c0_55 = arith.constant 0 : index
    %c0_56 = arith.constant 0 : index
    %78 = vector.load %arg6[%c0_55, %c0_56] : memref<32x32xbf16, #tpu.memory_space<vmem>>, vector<32x32xbf16>
    %cst_57 = arith.constant dense<0.000000e+00> : vector<8x32xf32>
    %79 = tpu.matmul %77, %78, %cst_57 {dimension_numbers = #tpu.dot_dimension_numbers<[1], [0], [0], [1], [0, 0, 1, 1], [], []>} : vector<8x32xbf16>, vector<32x32xbf16>, vector<8x32xf32> -> vector<8x32xf32>
    %c0_58 = arith.constant 0 : index
    %c0_59 = arith.constant 0 : index
    %80 = vector.load %arg7[%c0_58, %c0_59] : memref<1x32xf32, #tpu.memory_space<vmem>>, vector<1x32xf32>
    %81 = vector.broadcast %80 : vector<1x32xf32> to vector<8x32xf32>
    %82 = arith.addf %79, %81 : vector<8x32xf32>
    %c0_60 = arith.constant 0 : index
    %83 = arith.index_cast %52 : i32 to index
    %c0_61 = arith.constant 0 : index
    %84 = vector.load %arg1[%c0_60, %83, %c0_61] : memref<1x8x32xf32, #tpu.memory_space<vmem>>, vector<1x8x32xf32>
    %85 = vector.shape_cast %84 : vector<1x8x32xf32> to vector<8x32xf32>
    %86 = arith.addf %85, %82 : vector<8x32xf32>
    %c0_62 = arith.constant 0 : index
    %c0_63 = arith.constant 0 : index
    %87 = vector.load %arg8[%c0_62, %c0_63] : memref<1x32xf32, #tpu.memory_space<vmem>>, vector<1x32xf32>
    %c0_64 = arith.constant 0 : index
    %c0_65 = arith.constant 0 : index
    %88 = vector.load %arg9[%c0_64, %c0_65] : memref<1x32xf32, #tpu.memory_space<vmem>>, vector<1x32xf32>
    %cst_66 = arith.constant dense<0.000000e+00> : vector<8xf32>
    %89 = vector.multi_reduction <add>, %86, %cst_66 [1] : vector<8x32xf32> to vector<8xf32>
    %90 = vector.shape_cast %89 : vector<8xf32> to vector<8x1xf32>
    %cst_67 = arith.constant 3.200000e+01 : f32
    %91 = vector.broadcast %cst_67 : f32 to vector<8x1xf32>
    %92 = arith.divf %90, %91 : vector<8x1xf32>
    %93 = vector.broadcast %92 : vector<8x1xf32> to vector<8x32xf32>
    %94 = arith.subf %86, %93 : vector<8x32xf32>
    %95 = arith.mulf %94, %94 : vector<8x32xf32>
    %cst_68 = arith.constant dense<0.000000e+00> : vector<8xf32>
    %96 = vector.multi_reduction <add>, %95, %cst_68 [1] : vector<8x32xf32> to vector<8xf32>
    %97 = vector.shape_cast %96 : vector<8xf32> to vector<8x1xf32>
    %cst_69 = arith.constant 3.200000e+01 : f32
    %98 = vector.broadcast %cst_69 : f32 to vector<8x1xf32>
    %99 = arith.divf %97, %98 : vector<8x1xf32>
    %100 = vector.broadcast %92 : vector<8x1xf32> to vector<8x32xf32>
    %101 = arith.subf %86, %100 : vector<8x32xf32>
    %cst_70 = arith.constant 9.99999974E-6 : f32
    %102 = vector.broadcast %cst_70 : f32 to vector<8x1xf32>
    %103 = arith.addf %99, %102 : vector<8x1xf32>
    %104 = math.rsqrt %103 : vector<8x1xf32>
    %105 = vector.broadcast %104 : vector<8x1xf32> to vector<8x32xf32>
    %106 = arith.mulf %101, %105 : vector<8x32xf32>
    %107 = vector.broadcast %87 : vector<1x32xf32> to vector<8x32xf32>
    %108 = arith.mulf %106, %107 : vector<8x32xf32>
    %109 = vector.broadcast %88 : vector<1x32xf32> to vector<8x32xf32>
    %110 = arith.addf %108, %109 : vector<8x32xf32>
    %111 = arith.truncf %110 : vector<8x32xf32> to vector<8x32xbf16>
    %c0_71 = arith.constant 0 : index
    %c0_72 = arith.constant 0 : index
    %112 = vector.load %arg10[%c0_71, %c0_72] : memref<32x128xbf16, #tpu.memory_space<vmem>>, vector<32x128xbf16>
    %cst_73 = arith.constant dense<0.000000e+00> : vector<8x128xf32>
    %113 = tpu.matmul %111, %112, %cst_73 {dimension_numbers = #tpu.dot_dimension_numbers<[1], [0], [0], [1], [0, 0, 1, 1], [], []>} : vector<8x32xbf16>, vector<32x128xbf16>, vector<8x128xf32> -> vector<8x128xf32>
    %c0_74 = arith.constant 0 : index
    %c0_75 = arith.constant 0 : index
    %114 = vector.load %arg11[%c0_74, %c0_75] : memref<1x128xf32, #tpu.memory_space<vmem>>, vector<1x128xf32>
    %115 = vector.broadcast %114 : vector<1x128xf32> to vector<8x128xf32>
    %116 = arith.addf %113, %115 : vector<8x128xf32>
    %cst_76 = arith.constant 5.000000e-01 : f32
    %117 = vector.broadcast %cst_76 : f32 to vector<8x128xf32>
    %118 = arith.mulf %117, %116 : vector<8x128xf32>
    %cst_77 = arith.constant 4.471500e-02 : f32
    %119 = vector.broadcast %cst_77 : f32 to vector<8x128xf32>
    %120 = arith.mulf %119, %116 : vector<8x128xf32>
    %121 = arith.mulf %120, %116 : vector<8x128xf32>
    %122 = arith.mulf %121, %116 : vector<8x128xf32>
    %123 = arith.addf %116, %122 : vector<8x128xf32>
    %cst_78 = arith.constant 0.797884583 : f32
    %124 = vector.broadcast %cst_78 : f32 to vector<8x128xf32>
    %125 = arith.mulf %124, %123 : vector<8x128xf32>
    %126 = math.tanh %125 : vector<8x128xf32>
    %cst_79 = arith.constant 1.000000e+00 : f32
    %127 = vector.broadcast %cst_79 : f32 to vector<8x128xf32>
    %128 = arith.addf %127, %126 : vector<8x128xf32>
    %129 = arith.mulf %118, %128 : vector<8x128xf32>
    %130 = arith.truncf %129 : vector<8x128xf32> to vector<8x128xbf16>
    %c0_80 = arith.constant 0 : index
    %c0_81 = arith.constant 0 : index
    %131 = vector.load %arg12[%c0_80, %c0_81] : memref<128x32xbf16, #tpu.memory_space<vmem>>, vector<128x32xbf16>
    %cst_82 = arith.constant dense<0.000000e+00> : vector<8x32xf32>
    %132 = tpu.matmul %130, %131, %cst_82 {dimension_numbers = #tpu.dot_dimension_numbers<[1], [0], [0], [1], [0, 0, 1, 1], [], []>} : vector<8x128xbf16>, vector<128x32xbf16>, vector<8x32xf32> -> vector<8x32xf32>
    %c0_83 = arith.constant 0 : index
    %c0_84 = arith.constant 0 : index
    %133 = vector.load %arg13[%c0_83, %c0_84] : memref<1x32xf32, #tpu.memory_space<vmem>>, vector<1x32xf32>
    %134 = vector.broadcast %133 : vector<1x32xf32> to vector<8x32xf32>
    %135 = arith.addf %132, %134 : vector<8x32xf32>
    %136 = arith.addf %86, %135 : vector<8x32xf32>
    %c0_85 = arith.constant 0 : index
    %137 = arith.index_cast %52 : i32 to index
    %c0_86 = arith.constant 0 : index
    %138 = vector.load %arg14[%c0_85, %137, %c0_86] : memref<1x8x32xf32, #tpu.memory_space<vmem>>, vector<1x8x32xf32>
    %139 = vector.shape_cast %138 : vector<1x8x32xf32> to vector<8x32xf32>
    %140 = vector.shape_cast %136 : vector<8x32xf32> to vector<1x8x32xf32>
    tpu.vector_store %arg14[%c0_85, %137, %c0_86], %140 {strides = array<i32>} : memref<1x8x32xf32, #tpu.memory_space<vmem>>, vector<1x8x32xf32>,
    %c1_i32_87 = arith.constant 1 : i32
    return
  }
  func.func @transform_0(%arg0: i32) -> (i32, i32, i32) {
    %c0_i32 = arith.constant 0 : i32
    %c0_i32_0 = arith.constant 0 : i32
    %c0_i32_1 = arith.constant 0 : i32
    return %arg0, %c0_i32, %c0_i32_0 : i32, i32, i32
  }
  func.func @transform_1(%arg0: i32) -> (i32, i32) {
    %c0_i32 = arith.constant 0 : i32
    %c0_i32_0 = arith.constant 0 : i32
    %c0_i32_1 = arith.constant 0 : i32
    return %c0_i32, %c0_i32_0 : i32, i32
  }
  func.func @transform_2(%arg0: i32) -> (i32, i32) {
    %c0_i32 = arith.constant 0 : i32
    %c0_i32_0 = arith.constant 0 : i32
    %c0_i32_1 = arith.constant 0 : i32
    return %c0_i32, %c0_i32_0 : i32, i32
  }
  func.func @transform_3(%arg0: i32) -> (i32, i32) {
    %c0_i32 = arith.constant 0 : i32
    %c0_i32_0 = arith.constant 0 : i32
    %c0_i32_1 = arith.constant 0 : i32
    return %c0_i32, %c0_i32_0 : i32, i32
  }
  func.func @transform_4(%arg0: i32) -> (i32, i32) {
    %c0_i32 = arith.constant 0 : i32
    %c0_i32_0 = arith.constant 0 : i32
    %c0_i32_1 = arith.constant 0 : i32
    return %c0_i32, %c0_i32_0 : i32, i32
  }
  func.func @transform_5(%arg0: i32) -> (i32, i32) {
    %c0_i32 = arith.constant 0 : i32
    %c0_i32_0 = arith.constant 0 : i32
    %c0_i32_1 = arith.constant 0 : i32
    return %c0_i32, %c0_i32_0 : i32, i32
  }
  func.func @transform_6(%arg0: i32) -> (i32, i32) {
    %c0_i32 = arith.constant 0 : i32
    %c0_i32_0 = arith.constant 0 : i32
    %c0_i32_1 = arith.constant 0 : i32
    return %c0_i32, %c0_i32_0 : i32, i32
  }
  func.func @transform_7(%arg0: i32) -> (i32, i32) {
    %c0_i32 = arith.constant 0 : i32
    %c0_i32_0 = arith.constant 0 : i32
    %c0_i32_1 = arith.constant 0 : i32
    return %c0_i32, %c0_i32_0 : i32, i32
  }
  func.func @transform_8(%arg0: i32) -> (i32, i32) {
    %c0_i32 = arith.constant 0 : i32
    %c0_i32_0 = arith.constant 0 : i32
    %c0_i32_1 = arith.constant 0 : i32
    return %c0_i32, %c0_i32_0 : i32, i32
  }
  func.func @transform_9(%arg0: i32) -> (i32, i32) {
    %c0_i32 = arith.constant 0 : i32
    %c0_i32_0 = arith.constant 0 : i32
    %c0_i32_1 = arith.constant 0 : i32
    return %c0_i32, %c0_i32_0 : i32, i32
  }
  func.func @transform_10(%arg0: i32) -> (i32, i32) {
    %c0_i32 = arith.constant 0 : i32
    %c0_i32_0 = arith.constant 0 : i32
    %c0_i32_1 = arith.constant 0 : i32
    return %c0_i32, %c0_i32_0 : i32, i32
  }
  func.func @transform_11(%arg0: i32) -> (i32, i32) {
    %c0_i32 = arith.constant 0 : i32
    %c0_i32_0 = arith.constant 0 : i32
    %c0_i32_1 = arith.constant 0 : i32
    return %c0_i32, %c0_i32_0 : i32, i32
  }
  func.func @transform_12(%arg0: i32) -> (i32, i32) {
    %c0_i32 = arith.constant 0 : i32
    %c0_i32_0 = arith.constant 0 : i32
    %c0_i32_1 = arith.constant 0 : i32
    return %c0_i32, %c0_i32_0 : i32, i32
  }
  func.func @transform_13(%arg0: i32) -> (i32, i32, i32) {
    %c0_i32 = arith.constant 0 : i32
    %c0_i32_0 = arith.constant 0 : i32
    %c0_i32_1 = arith.constant 0 : i32
    return %arg0, %c0_i32, %c0_i32_0 : i32, i32, i32
  }
}

</mosaic_0001>

<bundles_post_ra>
// kernel: tpu_custom_call.1
= control target key start
LH: loop header
LB: loop body
LE: loop exit
PB: predicated region body
PF: predicated region fallthrough
CT: control target
= control target key end

     0   :  { %s2612_s0 = inlined_call_operand.vmem [shape: f32[2,8,32], index: 0, kind: input, shape index: {}]   ;;  %s2613_s1 = inlined_call_operand.vmem [shape: f32[1,32], index: 1, kind: input, shape index: {}]   ;;  %s2614_s2 = inlined_call_operand.vmem [shape: f32[1,32], index: 2, kind: input, shape index: {}]   ;;  %s2615_s3 = inlined_call_operand.vmem [shape: bf16[32,96], index: 3, kind: input, shape index: {}]   ;;  %s2616_s4 = inlined_call_operand.vmem [shape: f32[1,96], index: 4, kind: input, shape index: {}]   ;;  %s2617_s5 = inlined_call_operand.vmem [shape: bf16[32,32], index: 5, kind: input, shape index: {}]   ;;  %s2618_s6 = inlined_call_operand.vmem [shape: f32[1,32], index: 6, kind: input, shape index: {}]   ;;  %s2619_s7 = inlined_call_operand.vmem [shape: f32[1,32], index: 7, kind: input, shape index: {}]   ;;  %s2620_s8 = inlined_call_operand.vmem [shape: f32[1,32], index: 8, kind: input, shape index: {}]   ;;  %s2621_s9 = inlined_call_operand.vmem [shape: bf16[32,128], index: 9, kind: input, shape index: {}]   ;;  %s2622_s10 = inlined_call_operand.vmem [shape: f32[1,128], index: 10, kind: input, shape index: {}]   ;;  %s2623_s11 = inlined_call_operand.vmem [shape: bf16[128,32], index: 11, kind: input, shape index: {}]   ;;  %s2624_s12 = inlined_call_operand.vmem [shape: f32[1,32], index: 12, kind: input, shape index: {}]   ;;  %s2625_s13 = inlined_call_operand.hbm [shape: f32[2,8,32], index: 13, kind: output, shape index: {}]  }
   0x1   :  { %2626 = sst [smem:[#allocation11_spill]] %s2612_s0 }
   0x2   :  { %2627 = sst [smem:[#allocation12_spill]] %s2613_s1 }
   0x3   :  { %2628 = sst [smem:[#allocation13_spill]] %s2614_s2 }
   0x4   :  { %2629 = sst [smem:[#allocation14_spill]] %s2615_s3 }
   0x5   :  { %18 = vsyncpa [#allocation9], 0 }
   0x6   :  { %20 = vsyncpa [#allocation9 + $0x1], 0  ;;  %s2089_s25 = smov 0   ;;  %s2091_s26 = smov 0  }
   0x7   :  { %s2093_s27 = smov 0   ;;  %s2095_s28 = smov 0  }
   0x8 LB: > { %s2110_s29 = sadd.s32 4294967295, %s2003_s28   ;;  %s1733_s30 = sadd.s32 4294967294, %s2003_s28   ;;  %s2003_s28 = sphi %s2095_s28, %s2645_s28   ;;  %s1999_s27 = sphi %s2093_s27, %s2644_s27   ;;  %s1995_s26 = sphi %s2091_s26, %s2643_s26   ;;  %s1991_s25 = sphi %s2089_s25, %s2642_s25  }
   0x9   : > { %s2114_s14 = sadd.s32 1, %s2003_s28   ;;  %s311_s15 = sadd.s32 1, %s1999_s27 }
   0xa   : > { %s308_s16 = ssub.s32 %s2003_s28, %s2114_s14  ;;  %p321_p0 = scmp.ne.s32.totalorder %s1999_s27, %s1995_s26 }
   0xb   : > { %p309_p1 = scmp.eq.s32.totalorder %s308_s16, 0  ;;  %p322_p2 = scmp.eq.s32.totalorder %s2110_s29, 1 }
   0xc   : > { %p327_p3 = scmp.ne.s32.totalorder %s1995_s26, %s1991_s25  ;;  %p328_p4 = scmp.eq.s32.totalorder %s1733_s30, 1 }
   0xd   : > { %s2125_s17 = scalar_select %p309_p1, %s1999_s27, %s311_s15  }
   0xe   : > { %p2127_p5 = por %p322_p2, %p321_p0  ;;  %p2131_p6 = por %p328_p4, %p327_p3 }
   0xf   : > { %p1736_p7 = scmp.ge.s32.totalorder %s2003_s28, 1  ;;  %p389_p8 = scmp.lt.s32.totalorder %s2003_s28, 3 }
  0x11   : > { %p390_p9 = pnand %p1736_p7, %p389_p8 }
  0x12   : > { %p432_p10 = scmp.lt.s32.totalorder (!%p390_p9), %s2110_s29, 1  ;;  %s2632_s0 = sld [smem:[#allocation11_spill]] (!%p390_p9) }
  0x13   : > { %393 = sbr.rel (%p390_p9) target bundleno = 2189 (0x88d), region = 72  ;;  %s2633_s3 = sld [smem:[#allocation14_spill]] (!%p390_p9) }
  0x14   : > { %s2634_s1 = sld [smem:[#allocation12_spill]] (!%p390_p9)  ;;  %s2008_s22 = smov (!%p390_p9), 112  }
  0x15   : > { %s2635_s2 = sld [smem:[#allocation13_spill]] (!%p390_p9)  ;;  %s2009_s23 = smov (!%p390_p9), 96  }
  0x16   : > { %s2013_s30 = smov (!%p390_p9), 64   ;;  %s2016_s15 = smov (!%p390_p9), 24  }
  0x17   : > { %s2017_s16 = smov (!%p390_p9), 16  }
  0x18   : > { %s433_s20 = scalar_select %p432_p10, %s2110_s29, 1  ;;  %vm440_vm0 = vcmask 261120   ;;  %v2005_v2 = vmov 32.0   ;;  %v1902_v32 = vld [vmem:[%s2616_s4] ss:$0 sm:$0xff]  ;;  %vm527_vm5 = vcmask 1047556  }
  0x19   : > { %1908 = vrcp.f32 %v2005_v2  ;;  %v1811_v14 = vld [vmem:[%s2633_s3 + $0x8] sm:$0xff]  ;;  %v1810_v15 = vld [vmem:[%s2633_s3] sm:$0xff]  ;;  %v2010_v43 = vmov 1983009808   ;;  %v2011_v52 = vmov 1934713408  }
  0x1a   : > { %s1738_s21 = sshll.u32 %s433_s20, 3  ;;  %508 = vmatpush.bf16.msra.mxu0 %v1811_v14  ;;  %v1900_v25 = vld [vmem:[%s2634_s1] ss:$0 sm:$0xff]  ;;  %s2006_s20 = smov 104   ;;  %v532_v44 = vunpack.c.l.s4 %v2010_v43  ;;  %v556_v53 = vunpack.c.l.s4 %v2011_v52  ;;  %vm641_vm6 = vcmask 60416   ;;  %vm930_vm7 = vcmask 64512  }
  0x1b   : > { %s2142_s24 = scalar_lea.vmem %s2632_s0, %s1738_s21  ;;  %v1901_v28 = vld [vmem:[%s2635_s2] ss:$0 sm:$0xff]  ;;  %s2007_s21 = smov 120   ;;  %vm921_vm9 = vcmask 7168   ;;  %vm1156_vm10 = vcmask 1043456  }
  0x1c   : > { %v437_v0 = vld [vmem:[%s2142_s24] sm:$0xff]  ;;  %v2175_v49 = vunpack.c.0.s8 %v532_v44  ;;  %v2181_v58 = vunpack.c.0.s8 %v556_v53  ;;  %s429_s0 = sand.u32 1, %s1995_s26  }
  0x1d   : > { %v441_v1 = vsel %vm440_vm0, %v437_v0, 0.0  ;;  %s1737_s1 = sshll.u32 %s429_s0, 3 }
  0x1e   : > { %442 = vadd.xlane.f32.xlu0 %v441_v1  ;;  %509 = vmatpush.bf16.msra.mxu0 %v1810_v15 }
  0x1f   : > { %v1909_v3 = vpop.eup %1908 }
  0x20   : > { %v445_v4 = vmul.f32 32.0, %v1909_v3  ;;  %vm449_vm1 = vweird.f32 %v1909_v3 }
  0x22   : > { %v446_v5 = vsub.f32 1.0, %v445_v4 }
  0x24   : > { %v447_v6 = vmul.f32 %v1909_v3, %v446_v5 }
  0x26   : > { %v448_v7 = vadd.f32 %v1909_v3, %v447_v6 }
  0x28   : > { %v2146_v8 = vsel %vm449_vm1, %v1909_v3, %v448_v7 }
  0x91   : > { %v443_v9 = vpop.xlane.xlu0 %442 }
  0x92   : > { %v451_v10 = vmul.f32 %v2146_v8, %v443_v9 }
  0x94   : > { %v452_v11 = vsub.f32 %v437_v0, %v451_v10 }
  0x96   : > { %v453_v12 = vmul.f32 %v452_v11, %v452_v11 }
  0x98   : > { %v454_v13 = vsel %vm440_vm0, %v453_v12, 0.0 }
  0x99   : > { %455 = vadd.xlane.f32.xlu0 %v454_v13 }
 0x10c   : > { %v456_v16 = vpop.xlane.xlu0 %455 }
 0x10d   : > { %v457_v17 = vmul.f32 %v456_v16, %v2146_v8 }
 0x10f   : > { %v458_v18 = vadd.f32 1e-05, %v457_v17 }
 0x111   : > { %1910 = vrsqrt.f32 %v458_v18  ;;  %vm465_vm3 = vweird.f32 %v458_v18 }
 0x117   : > { %v1911_v19 = vpop.eup %1910 }
 0x118   : > { %v460_v20 = vmul.f32 %v1911_v19, %v458_v18  ;;  %vm466_vm2 = vweird.f32 %v1911_v19 }
 0x119   : > { %vm467_vm4 = vmor %vm465_vm3, %vm466_vm2 }
 0x11a   : > { %v461_v21 = vmul.f32 %v1911_v19, %v460_v20 }
 0x11c   : > { %v462_v22 = vmul.f32 0.5, %v461_v21 }
 0x11e   : > { %v463_v23 = vsub.f32 1.5, %v462_v22 }
 0x120   : > { %v464_v24 = vmul.f32 %v1911_v19, %v463_v23 }
 0x122   : > { %v468_v26 = vsel %vm467_vm4, %v1911_v19, %v464_v24 }
 0x123   : > { %v469_v27 = vmul.f32 %v468_v26, %v452_v11 }
 0x125   : > { %v473_v29 = vmul.f32 %v1900_v25, %v469_v27 }
 0x127   : > { %v477_v30 = vadd.f32 %v1901_v28, %v473_v29 }
 0x129   : > { %v478_v31 = vpack.c.bf16 %v477_v30, %v477_v30 }
 0x12b   : > { %1747 = vmatmul.msk.bf16.vlgmr.msra.gmra.mxu0 %vm440_vm0, %v478_v31 }
 0x1a8   : > { %v511_v33 = vpop.f32.mrf.mxu0 }
 0x1a9   : > { %v512_v34 = vadd.f32 %v1902_v32, %v511_v33 }
 0x1ab   : > { %651 = vrot.lane.b32.xlu2 %v512_v34, %s2006_s20  ;;  %647 = vrot.lane.b32.xlu1 %v512_v34, %s2007_s21  ;;  %v515_v36 = vmul.f32 0.35355338, %v512_v34 }
 0x1ad   : > { %v529_v55 = vrot.slane %v515_v36, 4 }
 0x1b0   : > { %v513_v35 = vpop.f32.mrf.mxu0 }
 0x1b3   : > { %649 = vrot.lane.b32.xlu1 %v512_v34, %s2008_s22 }
 0x1bb   : > { %517 = vrot.lane.b32.xlu1 %v515_v36, %s2007_s21 }
 0x1c3   : > { %523 = vrot.lane.b32.xlu1 %v515_v36, %s2006_s20  ;;  %s2018_s20 = smov 8  }
 0x205   : > { %v652_v39 = vpop.permute.xlu2 %651 }
 0x21d   : > { %v648_v37 = vpop.permute.xlu1 %647 }
 0x21e   : > { %v2167_v38 = vpack.i.bf16 %v648_v37, %v512_v34 }
 0x220   : > { %1878 = vrot.lane.b32.xlu2 %v2167_v38, %s2009_s23 }
 0x225   : > { %v650_v40 = vpop.permute.xlu1 %649 }
 0x226   : > { %v2170_v41 = vpack.i.bf16 %v652_v39, %v650_v40 }
 0x228   : > { %1883 = vrot.lane.b32.xlu0 %v2170_v41, %s2009_s23  ;;  %520 = vrot.lane.b32.xlu2 %v515_v36, %s2008_s22 }
 0x22d   : > { %v518_v42 = vpop.permute.xlu1 %517 }
 0x22e   : > { %v541_v47 = vrot.slane %v518_v42, 4 }
 0x235   : > { %v524_v45 = vpop.permute.xlu1 %523 }
 0x236   : > { %v539_v48 = vrot.slane %v524_v45, 4  ;;  %v542_v50 = vsel %vm527_vm5, %v524_v45, %v541_v47 }
 0x237   : > { %v550_v54 = vperm.slane %v542_v50, %v2175_v49 }
 0x238   : > { %v540_v51 = vsel %vm527_vm5, %v539_v48, %v518_v42 }
 0x239   : > { %v546_v56 = vperm.slane %v540_v51, %v2175_v49  ;;  %v563_v61 = vrot.slane %v550_v54, 4 }
 0x23b   : > { %v551_v0 = vrot.slane %v546_v56, 4 }
 0x27a   : > { %v2173_v46 = vpop.permute.xlu2 %1878 }
 0x27b   : > { %v1881_v40 = vunpack.i.h.bf16 %v2173_v46  ;;  %v1880_v45 = vunpack.i.l.bf16 %v2173_v46 }
 0x282   : > { %v521_v57 = vpop.permute.xlu2 %520 }
 0x283   : > { %v526_v59 = vrot.slane %v521_v57, 4  ;;  %v530_v60 = vsel %vm527_vm5, %v521_v57, %v529_v55 }
 0x284   : > { %v538_v62 = vperm.slane %v530_v60, %v2175_v49 }
 0x285   : > { %v528_v63 = vsel %vm527_vm5, %v526_v59, %v515_v36 }
 0x286   : > { %v534_v1 = vperm.slane %v528_v63, %v2175_v49  ;;  %v564_v2 = vsel %vm527_vm5, %v563_v61, %v538_v62  ;;  %v565_v3 = vrot.slane %v538_v62, 4  ;;  %v667_v63 = vrot.slane %v1880_v45, 4 }
 0x287   : > { %v570_v4 = vperm.slane %v564_v2, %v2181_v58 }
 0x288   : > { %v552_v5 = vsel %vm527_vm5, %v551_v0, %v534_v1  ;;  %v553_v6 = vrot.slane %v534_v1, 4  ;;  %v566_v7 = vsel %vm527_vm5, %v550_v54, %v565_v3  ;;  %v679_v54 = vrot.slane %v1881_v40, 4 }
 0x289   : > { %v558_v9 = vperm.slane %v552_v5, %v2181_v58  ;;  %v574_v10 = vperm.slane %v566_v7, %v2181_v58  ;;  %v579_v13 = vrot.slane %v570_v4, 4 }
 0x28a   : > { %v554_v11 = vsel %vm527_vm5, %v546_v56, %v553_v6 }
 0x28b   : > { %v562_v12 = vperm.slane %v554_v11, %v2181_v58  ;;  %v581_v14 = vrot.slane %v574_v10, 4  ;;  %v575_v15 = vrot.slane %v558_v9, 4  ;;  %v580_v22 = vsel %vm527_vm5, 0.0, %v579_v13 }
 0x28d   : > { %v577_v16 = vrot.slane %v562_v12, 4  ;;  %v582_v17 = vsel %vm527_vm5, 0.0, %v581_v14  ;;  %v594_v18 = vsel %vm527_vm5, %v581_v14, %v570_v4  ;;  %v576_v28 = vsel %vm527_vm5, 0.0, %v575_v15 }
 0x28e   : > { %v598_v19 = vperm.slane %v594_v18, %v2175_v49  ;;  %v599_v20 = vrot.slane %v582_v17, 4 }
 0x28f   : > { %v578_v21 = vsel %vm527_vm5, 0.0, %v577_v16  ;;  %v583_v23 = vsel %vm527_vm5, %v577_v16, %v558_v9 }
 0x290   : > { %v587_v24 = vperm.slane %v583_v23, %v2175_v49  ;;  %v588_v25 = vrot.slane %v578_v21, 4  ;;  %v600_v26 = vsel %vm527_vm5, %v599_v20, %v580_v22  ;;  %v619_v27 = vrot.slane %v598_v19, 4 }
 0x291   : > { %v604_v29 = vperm.slane %v600_v26, %v2175_v49 }
 0x292   : > { %v589_v30 = vsel %vm527_vm5, %v588_v25, %v576_v28  ;;  %v607_v31 = vrot.slane %v587_v24, 4 }
 0x293   : > { %v593_v32 = vperm.slane %v589_v30, %v2175_v49  ;;  %v617_v33 = vrot.slane %v604_v29, 4  ;;  %v620_v34 = vsel %vm527_vm5, %v604_v29, %v619_v27 }
 0x294   : > { %v628_v35 = vperm.slane %v620_v34, %v2181_v58 }
 0x295   : > { %v605_v36 = vrot.slane %v593_v32, 4  ;;  %v608_v37 = vsel %vm527_vm5, %v593_v32, %v607_v31  ;;  %v618_v39 = vsel %vm527_vm5, %v617_v33, %v598_v19 }
 0x296   : > { %v616_v42 = vperm.slane %v608_v37, %v2181_v58  ;;  %v624_v43 = vperm.slane %v618_v39, %v2181_v58  ;;  %v633_v44 = vrot.slane %v628_v35, 4 }
 0x297   : > { %v606_v47 = vsel %vm527_vm5, %v605_v36, %v587_v24 }
 0x298   : > { %v612_v48 = vperm.slane %v606_v47, %v2181_v58  ;;  %v629_v50 = vrot.slane %v624_v43, 4  ;;  %v634_v51 = vsel %vm527_vm5, %v633_v44, %v616_v42  ;;  %v635_v52 = vrot.slane %v616_v42, 4 }
 0x299   : > { %v639_v53 = vpack.c.bf16 %v634_v51, %v634_v51 }
 0x29a   : > { %v630_v55 = vsel %vm527_vm5, %v629_v50, %v612_v48  ;;  %v631_v56 = vrot.slane %v612_v48, 4  ;;  %v636_v57 = vsel %vm527_vm5, %v628_v35, %v635_v52  ;;  %v1884_v59 = vpop.permute.xlu0 %1883 }
 0x29b   : > { %v637_v60 = vpack.c.bf16 %v630_v55, %v630_v55  ;;  %v640_v61 = vpack.c.bf16 %v636_v57, %v636_v57  ;;  %644 = vst.msk [vmem:[#allocation2 + $0x8] sm:$0xf] %vm641_vm6, %v639_v53  ;;  %v1886_v46 = vunpack.i.h.bf16 %v1884_v59  ;;  %v1885_v62 = vunpack.i.l.bf16 %v1884_v59 }
 0x29c   : > { %v632_v0 = vsel %vm527_vm5, %v624_v43, %v631_v56 }
 0x29d   : > { %v638_v1 = vpack.c.bf16 %v632_v0, %v632_v0  ;;  %642 = vst.msk [vmem:[#allocation2] sm:$0xf] %vm641_vm6, %v637_v60  ;;  %v677_v2 = vrot.slane %v1886_v46, 4  ;;  %v680_v3 = vsel %vm527_vm5, %v1886_v46, %v679_v54  ;;  %v665_v4 = vrot.slane %v1885_v62, 4 }
 0x29e   : > { %645 = vst.msk [vmem:[#allocation2 + $0xc] sm:$0xf] %vm641_vm6, %v640_v61  ;;  %v688_v5 = vperm.slane %v680_v3, %v2175_v49  ;;  %v668_v6 = vsel %vm527_vm5, %v1885_v62, %v667_v63 }
 0x29f   : > { %643 = vst.msk [vmem:[#allocation2 + $0x4] sm:$0xf] %vm641_vm6, %v638_v1  ;;  %v678_v7 = vsel %vm527_vm5, %v677_v2, %v1881_v40  ;;  %v666_v9 = vsel %vm527_vm5, %v665_v4, %v1880_v45  ;;  %v676_v10 = vperm.slane %v668_v6, %v2175_v49 }
 0x2a0   : > { %v684_v11 = vperm.slane %v678_v7, %v2175_v49  ;;  %v701_v12 = vrot.slane %v688_v5, 4  ;;  %v672_v13 = vperm.slane %v666_v9, %v2175_v49 }
 0x2a1   : > { %v703_v14 = vrot.slane %v676_v10, 4 }
 0x2a2   : > { %v689_v15 = vrot.slane %v684_v11, 4  ;;  %v691_v16 = vrot.slane %v672_v13, 4  ;;  %v702_v17 = vsel %vm527_vm5, %v701_v12, %v676_v10 }
 0x2a3   : > { %v704_v18 = vsel %vm527_vm5, %v688_v5, %v703_v14  ;;  %v708_v19 = vperm.slane %v702_v17, %v2181_v58  ;;  %v915_v17 = vld [vmem:[#allocation2 + $0x8] sm:$0xf] }
 0x2a4   : > { %v690_v20 = vsel %vm527_vm5, %v689_v15, %v672_v13  ;;  %v692_v21 = vsel %vm527_vm5, %v684_v11, %v691_v16  ;;  %v712_v22 = vperm.slane %v704_v18, %v2181_v58  ;;  %v913_v18 = vld [vmem:[#allocation2] sm:$0xf] }
 0x2a5   : > { %v696_v23 = vperm.slane %v690_v20, %v2181_v58  ;;  %v700_v24 = vperm.slane %v692_v21, %v2181_v58  ;;  %v717_v28 = vrot.slane %v708_v19, 4  ;;  %v916_v16 = vld [vmem:[#allocation2 + $0xc] sm:$0xf]  ;;  %v917_v20 = vlaneseq }
 0x2a6   : > { %v719_v25 = vrot.slane %v712_v22, 4 }
 0x2a7   : > { %v713_v26 = vrot.slane %v696_v23, 4  ;;  %v715_v27 = vrot.slane %v700_v24, 4  ;;  %v718_v39 = vsel %vm527_vm5, 0.0, %v717_v28  ;;  %v918_v21 = vshrl.u32 %v917_v20, 7 }
 0x2a8   : > { %v720_v29 = vsel %vm527_vm5, 0.0, %v719_v25  ;;  %v732_v30 = vsel %vm527_vm5, %v719_v25, %v708_v19  ;;  %v914_v19 = vld [vmem:[#allocation2 + $0x4] sm:$0xf]  ;;  %v1020_v22 = vand.u32 127, %v917_v20 }
 0x2a9   : > { %v716_v31 = vsel %vm527_vm5, 0.0, %v715_v27  ;;  %v721_v32 = vsel %vm527_vm5, %v715_v27, %v696_v23  ;;  %v736_v33 = vperm.slane %v732_v30, %v2175_v49  ;;  %v737_v36 = vrot.slane %v720_v29, 4 }
 0x2aa   : > { %v725_v34 = vperm.slane %v721_v32, %v2175_v49  ;;  %v726_v35 = vrot.slane %v716_v31, 4  ;;  %v714_v37 = vsel %vm527_vm5, 0.0, %v713_v26  ;;  %vm1022_vm8 = vcmp.le.s32.totalorder %v1020_v22, %v918_v21 }
 0x2ab   : > { %v757_v40 = vrot.slane %v736_v33, 4  ;;  %v738_v43 = vsel %vm527_vm5, %v737_v36, %v718_v39  ;;  %v2012_v29 = vmov -inf  }
 0x2ac   : > { %v727_v42 = vsel %vm527_vm5, %v726_v35, %v714_v37  ;;  %v745_v44 = vrot.slane %v725_v34, 4  ;;  %v742_v47 = vperm.slane %v738_v43, %v2175_v49  ;;  %925 = vst.msk [vmem:[#allocation5 + $0x18] sm:$0xff] %vm921_vm9, %v2012_v29  ;;  %v2015_v43 = vmov 0.0  }
 0x2ad   : > { %v731_v45 = vperm.slane %v727_v42, %v2175_v49  ;;  %922 = vst.msk [vmem:[#allocation5] sm:$0xff] %vm921_vm9, %v2012_v29  ;;  %v2014_v42 = vmov 0  }
 0x2ae   : > { %v755_v51 = vrot.slane %v742_v47, 4  ;;  %v758_v52 = vsel %vm527_vm5, %v742_v47, %v757_v40  ;;  %923 = vst.msk [vmem:[#allocation5 + $0x8] sm:$0xff] %vm921_vm9, %v2012_v29  ;;  %1898 = vset.pattern.permute.xlu1 %v2014_v42  ;;  %1899 = vset.pattern.permute.xlu2 %v2014_v42 }
 0x2af   : > { %v743_v48 = vrot.slane %v731_v45, 4  ;;  %v746_v50 = vsel %vm527_vm5, %v731_v45, %v745_v44  ;;  %v766_v54 = vperm.slane %v758_v52, %v2181_v58  ;;  %924 = vst.msk [vmem:[#allocation5 + $0x10] sm:$0xff] %vm921_vm9, %v2012_v29  ;;  %1897 = vset.pattern.permute.xlu0 %v2014_v42 }
 0x2b0   : > { %v754_v53 = vperm.slane %v746_v50, %v2181_v58  ;;  %v756_v56 = vsel %vm527_vm5, %v755_v51, %v736_v33  ;;  %929 = vst.msk [vmem:[#allocation6 + $0x18] sm:$0xff] %vm921_vm9, %v2015_v43 }
 0x2b1   : > { %v744_v55 = vsel %vm527_vm5, %v743_v48, %v725_v34  ;;  %v762_v59 = vperm.slane %v756_v56, %v2181_v58  ;;  %v771_v60 = vrot.slane %v766_v54, 4  ;;  %926 = vst.msk [vmem:[#allocation6] sm:$0xff] %vm921_vm9, %v2015_v43 }
 0x2b2   : > { %v750_v57 = vperm.slane %v744_v55, %v2181_v58  ;;  %v773_v61 = vrot.slane %v754_v53, 4  ;;  %927 = vst.msk [vmem:[#allocation6 + $0x8] sm:$0xff] %vm921_vm9, %v2015_v43 }
 0x2b3   : > { %v767_v46 = vrot.slane %v762_v59, 4  ;;  %v772_v63 = vsel %vm527_vm5, %v771_v60, %v754_v53  ;;  %928 = vst.msk [vmem:[#allocation6 + $0x10] sm:$0xff] %vm921_vm9, %v2015_v43 }
 0x2b4   : > { %v769_v62 = vrot.slane %v750_v57, 4  ;;  %v774_v0 = vsel %vm527_vm5, %v766_v54, %v773_v61  ;;  %v777_v1 = vpack.c.bf16 %v772_v63, %v772_v63  ;;  %931 = vst.msk [vmem:[#allocation7] sm:$0xff] %vm930_vm7, %v2015_v43  ;;  %v2313_v44 = vld [vmem:[#allocation5] sm:$0xff] }
 0x2b5   : > { %v778_v2 = vpack.c.bf16 %v774_v0, %v774_v0  ;;  %v768_v3 = vsel %vm527_vm5, %v767_v46, %v750_v57  ;;  %932 = vst.msk [vmem:[#allocation7 + $0x8] sm:$0xff] %vm930_vm7, %v2015_v43  ;;  %v2332_v53 = vld [vmem:[#allocation5 + $0x8] sm:$0xff] }
 0x2b6   : > { %v770_v4 = vsel %vm527_vm5, %v762_v59, %v769_v62  ;;  %v775_v5 = vpack.c.bf16 %v768_v3, %v768_v3  ;;  %781 = vst.msk [vmem:[#allocation3 + $0x8] sm:$0xf] %vm641_vm6, %v777_v1  ;;  %v2330_v52 = vld [vmem:[#allocation5 + $0x10] sm:$0xff] }
 0x2b7   : > { %v776_v6 = vpack.c.bf16 %v770_v4, %v770_v4  ;;  %782 = vst.msk [vmem:[#allocation3 + $0xc] sm:$0xf] %vm641_vm6, %v778_v2 }
 0x2b8   : > { %779 = vst.msk [vmem:[#allocation3] sm:$0xf] %vm641_vm6, %v775_v5 }
 0x2b9   : > { %780 = vst.msk [vmem:[#allocation3 + $0x4] sm:$0xf] %vm641_vm6, %v776_v6 }
 0x2ba   : > { %933 = vst.msk [vmem:[#allocation7 + $0x10] sm:$0xff] %vm930_vm7, %v2015_v43 }
 0x2bb   : > { %934 = vst.msk [vmem:[#allocation7 + $0x18] sm:$0xff] %vm930_vm7, %v2015_v43 }
 0x2bd   : > { %v937_v9 = vld [vmem:[#allocation3 + $0x8] sm:$0xf] }
 0x2be   : > { %v938_v7 = vld [vmem:[#allocation3 + $0xc] sm:$0xf]  ;;  %v985_v11 = vsel %vm930_vm7, %v937_v9, 0 }
 0x2bf   : > { %v1004_v10 = vsel %vm930_vm7, %v938_v7, 0  ;;  %v935_v12 = vld [vmem:[#allocation3] sm:$0xf]  ;;  %994 = vmatpush.bf16.xpose.msra.mxu3 %v985_v11 }
 0x2c0   : > { %1013 = vmatpush.bf16.xpose.msrb.mxu0 %v1004_v10  ;;  %v947_v13 = vsel %vm930_vm7, %v935_v12, 0  ;;  %v936_v14 = vld [vmem:[#allocation3 + $0x4] sm:$0xf] }
 0x2c1   : > { %956 = vmatpush.bf16.xpose.msra.mxu1 %v947_v13  ;;  %v966_v15 = vsel %vm930_vm7, %v936_v14, 0 }
 0x2c2   : > { %975 = vmatpush.bf16.xpose.msra.mxu2 %v966_v15 }
 0x2c6   : > { %1750 = vmatmul.msk.bf16.vlgmr.msra.gmra.mxu3 %vm930_vm7, %v915_v17 }
 0x2c7   : > { %1751 = vmatmul.msk.bf16.vlgmr.msrb.gmra.mxu0 %vm930_vm7, %v916_v16 }
 0x2c8   : > { %1748 = vmatmul.msk.bf16.vlgmr.msra.gmra.mxu1 %vm930_vm7, %v913_v18 }
 0x2c9   : > { %1749 = vmatmul.msk.bf16.vlgmr.msra.gmra.mxu2 %vm930_vm7, %v914_v19 }
 0x344   : > { %v1015_v23 = vpop.f32.mrf.mxu0 }
 0x345   : > { %v2278_v24 = vsel %vm1022_vm8, %v1015_v23, -10000.0  ;;  %v958_v25 = vpop.f32.mrf.mxu1 }
 0x346   : > { %v1042_v26 = vsel %vm930_vm7, %v2278_v24, -inf  ;;  %v2283_v27 = vsel %vm1022_vm8, %v958_v25, -10000.0 }
 0x347   : > { %1043 = vmax.xlane.f32.xlu2 %v1042_v26  ;;  %v1033_v28 = vsel %vm930_vm7, %v2283_v27, -inf }
 0x348   : > { %1034 = vmax.xlane.f32.xlu0 %v1033_v28 }
 0x349   : > { %v996_v30 = vpop.f32.mrf.mxu3 }
 0x34a   : > { %v2290_v31 = vsel %vm1022_vm8, %v996_v30, -10000.0 }
 0x34b   : > { %v1039_v36 = vsel %vm930_vm7, %v2290_v31, -inf }
 0x34c   : > { %v1017_v32 = vpop.f32.mrf.mxu0  ;;  %v977_v33 = vpop.f32.mrf.mxu2 }
 0x34d   : > { %v960_v34 = vpop.f32.mrf.mxu1  ;;  %v2295_v35 = vsel %vm1022_vm8, %v977_v33, -10000.0 }
 0x34e   : > { %v1036_v37 = vsel %vm930_vm7, %v2295_v35, -inf }
 0x34f   : > { %1040 = vmax.xlane.f32.xlu2 %v1039_v36  ;;  %1037 = vmax.xlane.f32.xlu1 %v1036_v37 }
 0x351   : > { %v998_v39 = vpop.f32.mrf.mxu3 }
 0x354   : > { %v979_v40 = vpop.f32.mrf.mxu2 }
 0x367   : > { %1888 = vrot.lane.b32.xlu2 %v2167_v38, %s2013_s30  ;;  %v2311_v38 = vld [vmem:[#allocation5 + $0x18] sm:$0xff] }
 0x368   : > { %1893 = vrot.lane.b32.xlu1 %v2170_v41, %s2013_s30 }
 0x3ba   : > { %v1044_v41 = vpop.xlane.xlu2 %1043 }
 0x3bb   : > { %v2316_v45 = vmax.f32 %v2311_v38, %v1044_v41  ;;  %v1035_v47 = vpop.xlane.xlu0 %1034 }
 0x3bc   : > { %v2323_v50 = vmax.f32 %v2313_v44, %v1035_v47 }
 0x3bd   : > { %v1052_v48 = vsub.f32 %v2311_v38, %v2316_v45  ;;  %1241 = vst.msk [vmem:[#allocation5 + $0x18] sm:$0xff] %vm921_vm9, %v2316_v45 }
 0x3be   : > { %v1049_v51 = vsub.f32 %v2313_v44, %v2323_v50  ;;  %1238 = vst.msk [vmem:[#allocation5] sm:$0xff] %vm921_vm9, %v2323_v50  ;;  %1063 = vperm.xlu1 %1898, %v2323_v50  }
 0x3c2   : > { %v1041_v54 = vpop.xlane.xlu2 %1040  ;;  %v1038_v56 = vpop.xlane.xlu1 %1037 }
 0x3c3   : > { %v2335_v55 = vmax.f32 %v2330_v52, %v1041_v54  ;;  %v2338_v57 = vmax.f32 %v2332_v53, %v1038_v56 }
 0x3c5   : > { %v1051_v59 = vsub.f32 %v2330_v52, %v2335_v55  ;;  %1240 = vst.msk [vmem:[#allocation5 + $0x10] sm:$0xff] %vm921_vm9, %v2335_v55  ;;  %1073 = vperm.xlu0 %1897, %v2335_v55   ;;  %v1050_v60 = vsub.f32 %v2332_v53, %v2338_v57  ;;  %1068 = vperm.xlu2 %1899, %v2338_v57   ;;  %v1059_v52 = vmul.f32 1.442695, %v1052_v48  ;;  %v1053_v55 = vmul.f32 1.442695, %v1049_v51 }
 0x3c6   : > { %1239 = vst.msk [vmem:[#allocation5 + $0x8] sm:$0xff] %vm921_vm9, %v2338_v57 }
 0x3c7   : > { %v1055_v38 = vmul.f32 1.442695, %v1050_v60  ;;  %v1094_v60 = vld [vmem:[#allocation6 + $0x8] sm:$0xff] }
 0x3ca   : > { %v1889_v61 = vpop.permute.xlu2 %1888 }
 0x3cb   : > { %v1891_v46 = vunpack.i.h.bf16 %v1889_v61  ;;  %v1890_v62 = vunpack.i.l.bf16 %v1889_v61 }
 0x3cd   : > { %1078 = vperm.xlu2 %1899, %v2316_v45   ;;  %v809_v0 = vrot.slane %v1891_v46, 4  ;;  %v797_v1 = vrot.slane %v1890_v62, 4 }
 0x3da   : > { %v1894_v63 = vpop.permute.xlu1 %1893 }
 0x3db   : > { %v1896_v2 = vunpack.i.h.bf16 %v1894_v63  ;;  %v1895_v3 = vunpack.i.l.bf16 %v1894_v63 }
 0x3dd   : > { %v807_v4 = vrot.slane %v1896_v2, 4  ;;  %v810_v5 = vsel %vm527_vm5, %v1896_v2, %v809_v0  ;;  %v795_v6 = vrot.slane %v1895_v3, 4  ;;  %v798_v7 = vsel %vm527_vm5, %v1895_v3, %v797_v1 }
 0x3de   : > { %v818_v9 = vperm.slane %v810_v5, %v2175_v49  ;;  %v806_v10 = vperm.slane %v798_v7, %v2175_v49 }
 0x3df   : > { %v808_v11 = vsel %vm527_vm5, %v807_v4, %v1891_v46  ;;  %v796_v12 = vsel %vm527_vm5, %v795_v6, %v1890_v62 }
 0x3e0   : > { %v814_v13 = vperm.slane %v808_v11, %v2175_v49  ;;  %v831_v14 = vrot.slane %v818_v9, 4  ;;  %v802_v15 = vperm.slane %v796_v12, %v2175_v49  ;;  %v833_v16 = vrot.slane %v806_v10, 4 }
 0x3e2   : > { %v819_v17 = vrot.slane %v814_v13, 4  ;;  %v821_v18 = vrot.slane %v802_v15, 4  ;;  %v832_v19 = vsel %vm527_vm5, %v831_v14, %v806_v10  ;;  %v834_v20 = vsel %vm527_vm5, %v818_v9, %v833_v16 }
 0x3e3   : > { %v838_v21 = vperm.slane %v832_v19, %v2181_v58  ;;  %v842_v22 = vperm.slane %v834_v20, %v2181_v58 }
 0x3e4   : > { %v820_v23 = vsel %vm527_vm5, %v819_v17, %v802_v15  ;;  %v822_v25 = vsel %vm527_vm5, %v814_v13, %v821_v18 }
 0x3e5   : > { %v826_v26 = vperm.slane %v820_v23, %v2181_v58  ;;  %v830_v28 = vperm.slane %v822_v25, %v2181_v58  ;;  %v847_v29 = vrot.slane %v838_v21, 4  ;;  %v849_v30 = vrot.slane %v842_v22, 4 }
 0x3e7   : > { %v843_v32 = vrot.slane %v826_v26, 4  ;;  %v845_v33 = vrot.slane %v830_v28, 4  ;;  %v850_v34 = vsel %vm527_vm5, 0.0, %v849_v30  ;;  %v862_v36 = vsel %vm527_vm5, %v849_v30, %v838_v21 }
 0x3e8   : > { %v867_v37 = vrot.slane %v850_v34, 4  ;;  %v848_v40 = vsel %vm527_vm5, 0.0, %v847_v29  ;;  %v866_v43 = vperm.slane %v862_v36, %v2175_v49 }
 0x3e9   : > { %v846_v39 = vsel %vm527_vm5, 0.0, %v845_v33  ;;  %v851_v42 = vsel %vm527_vm5, %v845_v33, %v826_v26  ;;  %v844_v56 = vsel %vm527_vm5, 0.0, %v843_v32 }
 0x3ea   : > { %v855_v41 = vperm.slane %v851_v42, %v2175_v49  ;;  %v856_v47 = vrot.slane %v846_v39, 4  ;;  %v868_v54 = vsel %vm527_vm5, %v867_v37, %v848_v40  ;;  %v887_v46 = vrot.slane %v866_v43, 4 }
 0x3eb   : > { %v872_v61 = vperm.slane %v868_v54, %v2175_v49 }
 0x3ec   : > { %v857_v62 = vsel %vm527_vm5, %v856_v47, %v844_v56  ;;  %v875_v63 = vrot.slane %v855_v41, 4 }
 0x3ed   : > { %v861_v0 = vperm.slane %v857_v62, %v2175_v49  ;;  %v885_v1 = vrot.slane %v872_v61, 4  ;;  %v888_v2 = vsel %vm527_vm5, %v872_v61, %v887_v46 }
 0x3ee   : > { %v896_v3 = vperm.slane %v888_v2, %v2181_v58 }
 0x3ef   : > { %v873_v4 = vrot.slane %v861_v0, 4  ;;  %v876_v5 = vsel %vm527_vm5, %v861_v0, %v875_v63  ;;  %v886_v6 = vsel %vm527_vm5, %v885_v1, %v866_v43 }
 0x3f0   : > { %v884_v7 = vperm.slane %v876_v5, %v2181_v58  ;;  %v892_v9 = vperm.slane %v886_v6, %v2181_v58  ;;  %v901_v10 = vrot.slane %v896_v3, 4 }
 0x3f1   : > { %v874_v11 = vsel %vm527_vm5, %v873_v4, %v855_v41 }
 0x3f2   : > { %v880_v12 = vperm.slane %v874_v11, %v2181_v58  ;;  %v897_v13 = vrot.slane %v892_v9, 4  ;;  %v902_v14 = vsel %vm527_vm5, %v901_v10, %v884_v7  ;;  %v903_v15 = vrot.slane %v884_v7, 4 }
 0x3f3   : > { %v907_v16 = vpack.c.bf16 %v902_v14, %v902_v14  ;;  %v1093_v14 = vld [vmem:[#allocation6] sm:$0xff] }
 0x3f4   : > { %v898_v17 = vsel %vm527_vm5, %v897_v13, %v880_v12  ;;  %v899_v18 = vrot.slane %v880_v12, 4  ;;  %v904_v19 = vsel %vm527_vm5, %v896_v3, %v903_v15 }
 0x3f5   : > { %v905_v20 = vpack.c.bf16 %v898_v17, %v898_v17  ;;  %v908_v21 = vpack.c.bf16 %v904_v19, %v904_v19  ;;  %911 = vst.msk [vmem:[#allocation4 + $0x8] sm:$0xf] %vm641_vm6, %v907_v16  ;;  %v1095_v16 = vld [vmem:[#allocation6 + $0x10] sm:$0xff] }
 0x3f6   : > { %v900_v22 = vsel %vm527_vm5, %v892_v9, %v899_v18  ;;  %v1096_v9 = vld [vmem:[#allocation6 + $0x18] sm:$0xff] }
 0x3f7   : > { %v906_v23 = vpack.c.bf16 %v900_v22, %v900_v22  ;;  %909 = vst.msk [vmem:[#allocation4] sm:$0xf] %vm641_vm6, %v905_v20 }
 0x3f8   : > { %912 = vst.msk [vmem:[#allocation4 + $0xc] sm:$0xf] %vm641_vm6, %v908_v21 }
 0x3f9   : > { %910 = vst.msk [vmem:[#allocation4 + $0x4] sm:$0xf] %vm641_vm6, %v906_v23 }
 0x3fc   : > { %v941_v25 = vld [vmem:[#allocation4 + $0x8] sm:$0xf] }
 0x3fd   : > { %v1196_v26 = vsel %vm1156_vm10, %v941_v25, 0 }
 0x3fe   : > { %1205 = vmatpush.bf16.msrb.mxu3 %v1196_v26  ;;  %v939_v28 = vld [vmem:[#allocation4] sm:$0xf] }
 0x3ff   : > { %v1158_v29 = vsel %vm1156_vm10, %v939_v28, 0  ;;  %v942_v30 = vld [vmem:[#allocation4 + $0xc] sm:$0xf] }
 0x400   : > { %1167 = vmatpush.bf16.msrb.mxu1 %v1158_v29  ;;  %v1215_v32 = vsel %vm1156_vm10, %v942_v30, 0  ;;  %v940_v33 = vld [vmem:[#allocation4 + $0x4] sm:$0xf] }
 0x401   : > { %1224 = vmatpush.bf16.msra.mxu0 %v1215_v32  ;;  %v1177_v34 = vsel %vm1156_vm10, %v940_v33, 0  ;;  %v1123_v29 = vld [vmem:[#allocation7 + $0x10] sm:$0xff] }
 0x402   : > { %1186 = vmatpush.bf16.msrb.mxu2 %v1177_v34 }
 0x41f   : > { %v1069_v36 = vpop.permute.xlu2 %1068 }
 0x420   : > { %v1082_v37 = vsub.f32 %v2295_v35, %v1069_v36 }
 0x422   : > { %v1087_v39 = vmul.f32 1.442695, %v1082_v37 }
 0x424   : > { %1912 = vpow2.f32 %v1087_v39 }
 0x427   : > { %v1079_v40 = vpop.permute.xlu2 %1078 }
 0x428   : > { %v1084_v42 = vsub.f32 %v2278_v24, %v1079_v40 }
 0x42a   : > { %v1913_v43 = vpop.eup %1912  ;;  %v1091_v41 = vmul.f32 1.442695, %v1084_v42 }
 0x42b   : > { %v1150_v47 = vpack.c.bf16 %v1913_v43, %v1913_v43  ;;  %v1104_v7 = vsel %vm930_vm7, %v1913_v43, 0.0 }
 0x42c   : > { %1914 = vpow2.f32 %v1091_v41 }
 0x42d   : > { %1753 = vmatmul.msk.bf16.vlgmr.msrb.gmra.mxu2 %vm930_vm7, %v1150_v47 }
 0x430   : > { %v1064_v54 = vpop.permute.xlu1 %1063 }
 0x431   : > { %v1081_v56 = vsub.f32 %v2283_v27, %v1064_v54  ;;  %v1057_v27 = vmul.f32 1.442695, %v1051_v59  ;;  %v1124_v54 = vld [vmem:[#allocation7 + $0x18] sm:$0xff] }
 0x432   : > { %v1915_v61 = vpop.eup %1914 }
 0x433   : > { %v1152_v46 = vpack.c.bf16 %v1915_v61, %v1915_v61  ;;  %v1085_v62 = vmul.f32 1.442695, %v1081_v56  ;;  %v1110_v63 = vsel %vm930_vm7, %v1915_v61, 0.0  ;;  %v1122_v61 = vld [vmem:[#allocation7 + $0x8] sm:$0xff] }
 0x434   : > { %1111 = vadd.xlane.f32.xlu0 %v1110_v63 }
 0x435   : > { %1916 = vpow2.f32 %v1085_v62  ;;  %1755 = vmatmul.msk.bf16.vlgmr.msra.gmra.mxu0 %vm930_vm7, %v1152_v46 }
 0x437   : > { %v1074_v35 = vpop.permute.xlu0 %1073 }
 0x438   : > { %v1083_v24 = vsub.f32 %v2290_v31, %v1074_v35 }
 0x43a   : > { %v1089_v0 = vmul.f32 1.442695, %v1083_v24 }
 0x43b   : > { %v1917_v1 = vpop.eup %1916 }
 0x43c   : > { %1918 = vpow2.f32 %v1089_v0  ;;  %v1101_v2 = vsel %vm930_vm7, %v1917_v1, 0.0  ;;  %v1149_v3 = vpack.c.bf16 %v1917_v1, %v1917_v1 }
 0x43d   : > { %1102 = vadd.xlane.f32.xlu2 %v1101_v2  ;;  %1920 = vpow2.f32 %v1057_v27 }
 0x43e   : > { %1752 = vmatmul.msk.bf16.vlgmr.msrb.gmra.mxu1 %vm930_vm7, %v1149_v3  ;;  %1922 = vpow2.f32 %v1059_v52 }
 0x43f   : > { %1924 = vpow2.f32 %v1053_v55 }
 0x440   : > { %1926 = vpow2.f32 %v1055_v38 }
 0x442   : > { %v1919_v4 = vpop.eup %1918 }
 0x443   : > { %v1107_v5 = vsel %vm930_vm7, %v1919_v4, 0.0  ;;  %v1151_v6 = vpack.c.bf16 %v1919_v4, %v1919_v4  ;;  %v1921_v31 = vpop.eup %1920 }
 0x444   : > { %1108 = vadd.xlane.f32.xlu1 %v1107_v5  ;;  %v1923_v59 = vpop.eup %1922  ;;  %v1099_v17 = vmul.f32 %v1921_v31, %v1095_v16 }
 0x445   : > { %1754 = vmatmul.msk.bf16.vlgmr.msrb.gmra.mxu3 %vm930_vm7, %v1151_v6  ;;  %v1100_v10 = vmul.f32 %v1923_v59, %v1096_v9  ;;  %v1925_v13 = vpop.eup %1924 }
 0x446   : > { %v1097_v45 = vmul.f32 %v1925_v13, %v1093_v14  ;;  %v1927_v21 = vpop.eup %1926 }
 0x447   : > { %v1098_v23 = vmul.f32 %v1927_v21, %v1094_v60 }
 0x448   : > { %1137 = vperm.xlu0 %1897, %v1921_v31  }
 0x44c   : > { %1105 = vadd.xlane.f32.xlu1 %v1104_v7 }
 0x4a7   : > { %v1112_v11 = vpop.xlane.xlu0 %1111 }
 0x4a8   : > { %v1116_v12 = vadd.f32 %v1112_v11, %v1100_v10 }
 0x4aa   : > { %1120 = vst.msk [vmem:[#allocation6 + $0x18] sm:$0xff] %vm921_vm9, %v1116_v12 }
 0x4b0   : > { %v1103_v48 = vpop.xlane.xlu2 %1102  ;;  %v2420_v15 = vpop.f32.mrf.mxu2 }
 0x4b1   : > { %v1113_v44 = vadd.f32 %v1103_v48, %v1097_v45  ;;  %v1249_v50 = vld [vmem:[#allocation6 + $0x18] sm:$0xff] }
 0x4b2   : > { %v1226_v51 = vpop.f32.mrf.mxu0  ;;  %1267 = vperm.xlu0 %1897, %v1249_v50  }
 0x4b3   : > { %1117 = vst.msk [vmem:[#allocation6] sm:$0xff] %vm921_vm9, %v1113_v44 }
 0x4b7   : > { %v1109_v18 = vpop.xlane.xlu1 %1108 }
 0x4b8   : > { %v1115_v19 = vadd.f32 %v1109_v18, %v1099_v17  ;;  %v1190_v20 = vpop.f32.mrf.mxu2 }
 0x4ba   : > { %1119 = vst.msk [vmem:[#allocation6 + $0x10] sm:$0xff] %vm921_vm9, %v1115_v19  ;;  %v1228_v53 = vpop.f32.mrf.mxu0  ;;  %v1246_v57 = vld [vmem:[#allocation6] sm:$0xff]  ;;  %1132 = vperm.xlu0 %1897, %v1927_v21   ;;  %v1138_v30 = vpop.permute.xlu0 %1137 }
 0x4bb   : > { %1252 = vperm.xlu1 %1898, %v1246_v57   ;;  %v2424_v22 = vpop.f32.mrf.mxu1  ;;  %v1147_v33 = vmul.f32 %v1138_v30, %v1123_v29 }
 0x4bf   : > { %v1106_v25 = vpop.xlane.xlu1 %1105 }
 0x4c0   : > { %v1114_v26 = vadd.f32 %v1106_v25, %v1098_v23 }
 0x4c1   : > { %v1248_v28 = vld [vmem:[#allocation6 + $0x10] sm:$0xff] }
 0x4c2   : > { %1118 = vst.msk [vmem:[#allocation6 + $0x8] sm:$0xff] %vm921_vm9, %v1114_v26  ;;  %1262 = vperm.xlu2 %1899, %v1248_v28  }
 0x4c3   : > { %1127 = vperm.xlu1 %1898, %v1925_v13   ;;  %v1171_v32 = vpop.f32.mrf.mxu1  ;;  %v1121_v13 = vld [vmem:[#allocation7] sm:$0xff] }
 0x4c8   : > { %v1207_v34 = vpop.f32.mrf.mxu3 }
 0x4c9   : > { %v1232_v36 = vadd.f32 %v1207_v34, %v1147_v33  ;;  %v1247_v37 = vld [vmem:[#allocation6 + $0x8] sm:$0xff] }
 0x4ca   : > { %1257 = vperm.xlu2 %1899, %v1247_v37  }
 0x4cb   : > { %1236 = vst.msk [vmem:[#allocation7 + $0x10] sm:$0xff] %vm930_vm7, %v1232_v36 }
 0x4d0   : > { %v1209_v39 = vpop.f32.mrf.mxu3 }
 0x4d2   : > { %1142 = vperm.xlu2 %1899, %v1923_v59  }
 0x51c   : > { %v2428_v40 = vpop.permute.xlu2 %1262 }
 0x51d   : > { %1928 = vrcp.f32 %v2428_v40  ;;  %vm1305_vm2 = vweird.f32 %v2428_v40  ;;  %v1309_v17 = vand.u32 2147483647, %v2428_v40 }
 0x51f   : > { %vm1310_vm9 = vcmp.eq.f32.partialorder %v1309_v17, 8.507059e+37 }
 0x523   : > { %v2431_v41 = vpop.eup %1928 }
 0x524   : > { %v1258_v42 = vpop.permute.xlu2 %1257  ;;  %v1268_v43 = vpop.permute.xlu0 %1267  ;;  %v1301_v47 = vmul.f32 %v2431_v41, %v2428_v40  ;;  %vm1306_vm14 = vweird.f32 %v2431_v41 }
 0x525   : > { %1930 = vrcp.f32 %v1258_v42  ;;  %vm1320_vm12 = vweird.f32 %v1268_v43  ;;  %v1326_v55 = vand.u32 2147483648, %v1268_v43  ;;  %v1324_v10 = vand.u32 2147483647, %v1268_v43  ;;  %vm2463_vm6 = vmor %vm1305_vm2, %vm1306_vm14 }
 0x526   : > { %1932 = vrcp.f32 %v1268_v43  ;;  %v1302_v35 = vsub.f32 1.0, %v1301_v47  ;;  %v1296_v11 = vand.u32 2147483648, %v1258_v42  ;;  %vm1290_vm1 = vweird.f32 %v1258_v42 }
 0x527   : > { %v1294_v45 = vand.u32 2147483647, %v1258_v42  ;;  %v1327_v50 = vor.u32 1.1754944e-38, %v1326_v55  ;;  %vm1325_vm4 = vcmp.eq.f32.partialorder %v1324_v10, 8.507059e+37  ;;  %vm1453_vm14 = vcmask 130048  }
 0x528   : > { %v1303_v31 = vmul.f32 %v2431_v41, %v1302_v35  ;;  %v1297_v21 = vor.u32 1.1754944e-38, %v1296_v11 }
 0x529   : > { %vm1295_vm8 = vcmp.eq.f32.partialorder %v1294_v45, 8.507059e+37 }
 0x52a   : > { %v1304_v38 = vadd.f32 %v2431_v41, %v1303_v31 }
 0x52b   : > { %v1931_v56 = vpop.eup %1930 }
 0x52c   : > { %v1933_v46 = vpop.eup %1932  ;;  %v1286_v62 = vmul.f32 %v1931_v56, %v1258_v42  ;;  %v1143_v63 = vpop.permute.xlu2 %1142  ;;  %vm1291_vm13 = vweird.f32 %v1931_v56  ;;  %v1308_v23 = vsel %vm2463_vm6, %v2431_v41, %v1304_v38  ;;  %v1244_v42 = vld [vmem:[#allocation7 + $0x10] sm:$0xff] }
 0x52d   : > { %v1316_v24 = vmul.f32 %v1933_v46, %v1268_v43  ;;  %v1148_v0 = vmul.f32 %v1143_v63, %v1124_v54  ;;  %v1133_v1 = vpop.permute.xlu0 %1132  ;;  %v2435_v3 = vpop.permute.xlu1 %1252  ;;  %vm1321_vm11 = vweird.f32 %v1933_v46  ;;  %vm2453_vm3 = vmor %vm1290_vm1, %vm1291_vm13 }
 0x52e   : > { %v1287_v2 = vsub.f32 1.0, %v1286_v62  ;;  %v1146_v27 = vmul.f32 %v1133_v1, %v1122_v61  ;;  %1934 = vrcp.f32 %v2435_v3  ;;  %vm2443_vm15 = vmor %vm1320_vm12, %vm1321_vm11  ;;  %v1281_v39 = vand.u32 2147483648, %v2435_v3 }
 0x52f   : > { %v1317_v4 = vsub.f32 1.0, %v1316_v24  ;;  %v1233_v5 = vadd.f32 %v1226_v51, %v1148_v0  ;;  %vm1275_vm11 = vweird.f32 %v2435_v3 }
 0x530   : > { %v1288_v6 = vmul.f32 %v1931_v56, %v1287_v2  ;;  %v1231_v52 = vadd.f32 %v2420_v15, %v1146_v27  ;;  %v1311_v15 = vand.u32 2147483648, %v2428_v40  ;;  %v1279_v40 = vand.u32 2147483647, %v2435_v3 }
 0x531   : > { %v1318_v7 = vmul.f32 %v1933_v46, %v1317_v4  ;;  %1237 = vst.msk [vmem:[#allocation7 + $0x18] sm:$0xff] %vm930_vm7, %v1233_v5  ;;  %v1282_v54 = vor.u32 1.1754944e-38, %v1281_v39 }
 0x532   : > { %v1289_v59 = vadd.f32 %v1931_v56, %v1288_v6  ;;  %1235 = vst.msk [vmem:[#allocation7 + $0x8] sm:$0xff] %vm930_vm7, %v1231_v52  ;;  %v1312_v28 = vor.u32 1.1754944e-38, %v1311_v15  ;;  %vm1280_vm13 = vcmp.eq.f32.partialorder %v1279_v40, 8.507059e+37 }
 0x533   : > { %v1319_v9 = vadd.f32 %v1933_v46, %v1318_v7 }
 0x534   : > { %v1935_v14 = vpop.eup %1934  ;;  %v1293_v18 = vsel %vm2453_vm3, %v1931_v56, %v1289_v59  ;;  %v1313_v36 = vsel %vm1310_vm9, %v1312_v28, %v1308_v23 }
 0x535   : > { %v1323_v48 = vsel %vm2443_vm15, %v1933_v46, %v1319_v9  ;;  %v1271_v51 = vmul.f32 %v1935_v14, %v2435_v3  ;;  %v1128_v16 = vpop.permute.xlu1 %1127  ;;  %v1298_v29 = vsel %vm1295_vm8, %v1297_v21, %v1293_v18  ;;  %vm1276_vm10 = vweird.f32 %v1935_v14 }
 0x536   : > { %v1145_v19 = vmul.f32 %v1128_v16, %v1121_v13  ;;  %v1328_v53 = vsel %vm1325_vm4, %v1327_v50, %v1323_v48  ;;  %vm1277_vm12 = vmor %vm1275_vm11, %vm1276_vm10  ;;  %v1314_v43 = vmul.f32 %v1313_v36, %v1244_v42  ;;  %vm1455_vm15 = vcmask 195584  }
 0x537   : > { %v1272_v57 = vsub.f32 1.0, %v1271_v51 }
 0x538   : > { %v1245_v60 = vld [vmem:[#allocation7 + $0x18] sm:$0xff]  ;;  %v1230_v25 = vadd.f32 %v2424_v22, %v1145_v19  ;;  %v1330_v63 = vrot.slane %v1314_v43, 4 }
 0x539   : > { %v1329_v26 = vmul.f32 %v1328_v53, %v1245_v60  ;;  %v1273_v30 = vmul.f32 %v1935_v14, %v1272_v57  ;;  %v1243_v32 = vld [vmem:[#allocation7 + $0x8] sm:$0xff] }
 0x53a   : > { %1234 = vst.msk [vmem:[#allocation7] sm:$0xff] %vm930_vm7, %v1230_v25  ;;  %v1299_v33 = vmul.f32 %v1298_v29, %v1243_v32 }
 0x53b   : > { %v1342_v34 = vrot.slane %v1329_v26, 4  ;;  %v1274_v37 = vadd.f32 %v1935_v14, %v1273_v30 }
 0x53c   : > { %v1344_v22 = vrot.slane %v1299_v33, 4 }
 0x53d   : > { %v1278_v41 = vsel %vm1277_vm12, %v1935_v14, %v1274_v37  ;;  %v1343_v47 = vsel %vm527_vm5, %v1342_v34, %v1299_v33 }
 0x53e   : > { %v1345_v56 = vsel %vm527_vm5, %v1329_v26, %v1344_v22  ;;  %v1283_v61 = vsel %vm1280_vm13, %v1282_v54, %v1278_v41  ;;  %v1349_v62 = vperm.slane %v1343_v47, %v2175_v49 }
 0x53f   : > { %v1353_v24 = vperm.slane %v1345_v56, %v2175_v49  ;;  %v1813_v56 = vld [vmem:[%s2617_s5 + $0x8] sm:$0xff] }
 0x540   : > { %v1354_v3 = vrot.slane %v1349_v62, 4  ;;  %1487 = vmatpush.bf16.msra.mxu1 %v1813_v56 }
 0x541   : > { %v1242_v46 = vld [vmem:[#allocation7] sm:$0xff]  ;;  %v1366_v31 = vrot.slane %v1353_v24, 4 }
 0x542   : > { %v1284_v35 = vmul.f32 %v1283_v61, %v1242_v46 }
 0x544   : > { %v1331_v0 = vsel %vm527_vm5, %v1330_v63, %v1284_v35  ;;  %v1332_v1 = vrot.slane %v1284_v35, 4 }
 0x545   : > { %v1337_v2 = vperm.slane %v1331_v0, %v2175_v49 }
 0x546   : > { %v1333_v27 = vsel %vm527_vm5, %v1314_v43, %v1332_v1  ;;  %v1903_v1 = vld [vmem:[%s2618_s6] ss:$0 sm:$0xff] }
 0x547   : > { %v1341_v4 = vperm.slane %v1333_v27, %v2175_v49  ;;  %v1355_v5 = vsel %vm527_vm5, %v1354_v3, %v1337_v2  ;;  %v1356_v6 = vrot.slane %v1337_v2, 4  ;;  %v1940_v27 = vld [vmem:[%s2142_s24] sm:$0xff] }
 0x548   : > { %v1361_v7 = vperm.slane %v1355_v5, %v2181_v58 }
 0x549   : > { %v1357_v52 = vsel %vm527_vm5, %v1349_v62, %v1356_v6  ;;  %v1367_v55 = vsel %vm527_vm5, %v1366_v31, %v1341_v4  ;;  %v1368_v59 = vrot.slane %v1341_v4, 4 }
 0x54a   : > { %v1365_v9 = vperm.slane %v1357_v52, %v2181_v58  ;;  %v1373_v10 = vperm.slane %v1367_v55, %v2181_v58  ;;  %v1378_v13 = vrot.slane %v1361_v7, 4 }
 0x54b   : > { %v1369_v11 = vsel %vm527_vm5, %v1353_v24, %v1368_v59 }
 0x54c   : > { %v1377_v12 = vperm.slane %v1369_v11, %v2181_v58  ;;  %v1380_v14 = vrot.slane %v1365_v9, 4  ;;  %v1382_v45 = vrot.slane %v1373_v10, 4  ;;  %v1379_v51 = vsel %vm527_vm5, 0.0, %v1378_v13  ;;  %v1815_v9 = vld [vmem:[%s2621_s9 + $0x8] sm:$0xff]  ;;  %v1823_v11 = vld [vmem:[%s2623_s11 + $0x38] sm:$0xff] }
 0x54d   : > { %1558 = vmatpush.bf16.msra.mxu2 %v1815_v9  ;;  %1643 = vmatpush.bf16.msra.mxu3 %v1823_v11 }
 0x54e   : > { %v1381_v38 = vsel %vm527_vm5, 0.0, %v1380_v14  ;;  %v1384_v48 = vrot.slane %v1377_v12, 4  ;;  %v1386_v15 = vsel %vm527_vm5, %v1380_v14, %v1361_v7  ;;  %v1383_v53 = vsel %vm527_vm5, 0.0, %v1382_v45  ;;  %v1822_v14 = vld [vmem:[%s2623_s11 + $0x30] sm:$0xff] }
 0x54f   : > { %v1390_v44 = vperm.slane %v1386_v15, %v2175_v49  ;;  %v1391_v50 = vrot.slane %v1381_v38, 4 }
 0x550   : > { %v1385_v16 = vsel %vm527_vm5, 0.0, %v1384_v48  ;;  %v1397_v17 = vsel %vm527_vm5, %v1384_v48, %v1373_v10  ;;  %v1814_v10 = vld [vmem:[%s2621_s9] sm:$0xff] }
 0x551   : > { %v1392_v18 = vsel %vm527_vm5, %v1391_v50, %v1379_v51  ;;  %v1401_v19 = vperm.slane %v1397_v17, %v2175_v49  ;;  %v1402_v20 = vrot.slane %v1385_v16, 4  ;;  %v1410_v21 = vrot.slane %v1390_v44, 4  ;;  %1559 = vmatpush.bf16.msra.mxu2 %v1814_v10  ;;  %1644 = vmatpush.bf16.msra.mxu3 %v1822_v14 }
 0x552   : > { %v1396_v57 = vperm.slane %v1392_v18, %v2175_v49  ;;  %v1905_v18 = vld [vmem:[%s2620_s8] ss:$0 sm:$0xff] }
 0x553   : > { %v1403_v60 = vsel %vm527_vm5, %v1402_v20, %v1383_v53  ;;  %v1422_v23 = vrot.slane %v1401_v19, 4  ;;  %v1821_v53 = vld [vmem:[%s2623_s11 + $0x28] sm:$0xff] }
 0x554   : > { %v1407_v25 = vperm.slane %v1403_v60, %v2175_v49  ;;  %v1411_v26 = vsel %vm527_vm5, %v1396_v57, %v1410_v21  ;;  %v1408_v28 = vrot.slane %v1396_v57, 4  ;;  %v1820_v57 = vld [vmem:[%s2623_s11 + $0x20] sm:$0xff]  ;;  %v1819_v60 = vld [vmem:[%s2623_s11 + $0x18] sm:$0xff] }
 0x555   : > { %v1419_v29 = vperm.slane %v1411_v26, %v2181_v58  ;;  %1645 = vmatpush.bf16.msra.mxu3 %v1821_v53  ;;  %v1816_v26 = vld [vmem:[%s2623_s11] sm:$0xff] }
 0x556   : > { %v1423_v30 = vsel %vm527_vm5, %v1407_v25, %v1422_v23  ;;  %v1409_v32 = vsel %vm527_vm5, %v1408_v28, %v1390_v44  ;;  %v1420_v33 = vrot.slane %v1407_v25, 4  ;;  %v1818_v23 = vld [vmem:[%s2623_s11 + $0x10] sm:$0xff]  ;;  %v1817_v25 = vld [vmem:[%s2623_s11 + $0x8] sm:$0xff]  ;;  %v1906_v28 = vld [vmem:[%s2622_s10] ss:$0 sm:$0xff] }
 0x557   : > { %v1431_v34 = vperm.slane %v1423_v30, %v2181_v58  ;;  %v1438_v36 = vrot.slane %v1419_v29, 4  ;;  %v1415_v37 = vperm.slane %v1409_v32, %v2181_v58 }
 0x558   : > { %v1421_v39 = vsel %vm527_vm5, %v1420_v33, %v1401_v19 }
 0x559   : > { %v1439_v40 = vsel %vm527_vm5, %v1431_v34, %v1438_v36  ;;  %v1436_v49 = vrot.slane %v1431_v34, 4  ;;  %v1427_v22 = vperm.slane %v1421_v39, %v2181_v58  ;;  %v1434_v42 = vrot.slane %v1415_v37, 4  ;;  %v1812_v58 = vld [vmem:[%s2617_s5] sm:$0xff]  ;;  %1646 = vmatpush.bf16.msra.mxu3 %v1820_v57 }
 0x55a   : > { %1449 = vrot.lane.b32.xlu0 %v1439_v40, %s2016_s15  ;;  %1488 = vmatpush.bf16.msra.mxu1 %v1812_v58  ;;  %s431_s15 = scalar_lea.vmem [#allocation8], %s1737_s1  ;;  %s1961_s1 = scalar_lea.hbm %s2625_s13, 16 }
 0x55b   : > { %v1437_v43 = vsel %vm527_vm5, %v1436_v49, %v1419_v29  ;;  %v1432_v41 = vrot.slane %v1427_v22, 4  ;;  %v1435_v47 = vsel %vm527_vm5, %v1427_v22, %v1434_v42 }
 0x55c   : > { %1445 = vrot.lane.b32.xlu2 %v1437_v43, %s2017_s16  ;;  %1441 = vrot.lane.b32.xlu1 %v1435_v47, %s2018_s20  ;;  %s1807_s20 = sshll.u32 %s2110_s29, 3  ;;  %s1671_s16 = sshll.u32 %s431_s15, 4  ;;  %s1672_s16 = int_to_ptr.vmem [resolvable:$true] %s1671_s16 }
 0x55d   : > { %v1433_v54 = vsel %vm527_vm5, %v1432_v41, %v1415_v37  ;;  %1647 = vmatpush.bf16.msra.mxu3 %v1819_v60  ;;  %v1907_v41 = vld [vmem:[%s2624_s12] ss:$0 sm:$0xff]  ;;  %s1669_s30 = scalar_lea.hbm %s2625_s13, %s1807_s20  ;;  %s1659_s29 = scalar_lea.sflag [#allocation9], %s429_s0 }
 0x55e   : > { %s1673_s2 = sshll.u32 %s1669_s30, 4  ;;  %s1674_s2 = int_to_ptr.hbm [resolvable:$true] %s1673_s2 }
 0x55f   : > { %s1955_s3 = sshra.s32 %s1674_s2, 4  ;;  %s1956_s3 = int_to_ptr.hbm [resolvable:$true] %s1955_s3 }
 0x560   : > { %s1957_s21 = scalar_lea.hbm %s1956_s3, 8  ;;  %p1962_p0 = scmp.lt.s32.totalorder %s1956_s3, %s2625_s13 }
 0x561   : > { %1648 = vmatpush.bf16.msra.mxu3 %v1818_v23  ;;  %p1958_p11 = scmp.ne.s32.totalorder %s1956_s3, %s1957_s21  ;;  %p1963_p1 = scmp.lt.s32.totalorder %s1961_s1, %s1957_s21 }
 0x563   : > { %p1959_p12 = pnand %p1958_p11, %p2127_p5  ;;  %p1964_p2 = por %p1963_p1, %p1962_p0 }
 0x565   : > { %1649 = vmatpush.bf16.msra.mxu3 %v1817_v25  ;;  %p1960_p13 = pneg %p1959_p12 }
 0x567   : > { %p1965_p3 = pnand %p1964_p2, %p1960_p13 }
 0x569   : > { %1650 = vmatpush.bf16.msra.mxu3 %v1816_v26 }
 0x5b6   : > { %v1446_v46 = vpop.permute.xlu2 %1445 }
 0x5cc   : > { %v1450_v63 = vpop.permute.xlu0 %1449 }
 0x5ce   : > { %v1442_v61 = vpop.permute.xlu1 %1441 }
 0x5cf   : > { %v1452_v62 = vsel %vm930_vm7, %v1433_v54, %v1442_v61 }
 0x5d0   : > { %v1454_v35 = vsel %vm1453_vm14, %v1452_v62, %v1446_v46 }
 0x5d1   : > { %v1456_v24 = vsel %vm1455_vm15, %v1454_v35, %v1450_v63 }
 0x5d2   : > { %v1457_v0 = vpack.c.bf16 %v1456_v24, %v1456_v24 }
 0x5d4   : > { %1764 = vmatmul.msk.bf16.vlgmr.msra.gmra.mxu1 %vm440_vm0, %v1457_v0 }
 0x651   : > { %v1490_v2 = vpop.f32.mrf.mxu1 }
 0x652   : > { %v1491_v3 = vadd.f32 %v1903_v1, %v1490_v2 }
 0x654   : > { %v2527_v4 = vadd.f32 %v1940_v27, %v1491_v3 }
 0x656   : > { %v1498_v5 = vsel %vm440_vm0, %v2527_v4, 0.0 }
 0x657   : > { %1499 = vadd.xlane.f32.xlu1 %v1498_v5 }
 0x659   : > { %v1492_v6 = vpop.f32.mrf.mxu1 }
 0x6ca   : > { %v1500_v31 = vpop.xlane.xlu1 %1499 }
 0x6cb   : > { %v1501_v7 = vmul.f32 %v1500_v31, %v2146_v8 }
 0x6cd   : > { %v1502_v52 = vsub.f32 %v2527_v4, %v1501_v7 }
 0x6cf   : > { %v1503_v55 = vmul.f32 %v1502_v52, %v1502_v52 }
 0x6d1   : > { %v1504_v59 = vsel %vm440_vm0, %v1503_v55, 0.0 }
 0x6d2   : > { %1505 = vadd.xlane.f32.xlu2 %v1504_v59 }
 0x745   : > { %v1506_v12 = vpop.xlane.xlu2 %1505 }
 0x746   : > { %v1507_v13 = vmul.f32 %v1506_v12, %v2146_v8  ;;  %v1904_v8 = vld [vmem:[%s2619_s7] ss:$0 sm:$0xff] }
 0x748   : > { %v1508_v38 = vadd.f32 1e-05, %v1507_v13 }
 0x74a   : > { %1936 = vrsqrt.f32 %v1508_v38  ;;  %vm1515_vm7 = vweird.f32 %v1508_v38 }
 0x750   : > { %v1937_v45 = vpop.eup %1936 }
 0x751   : > { %v1510_v48 = vmul.f32 %v1937_v45, %v1508_v38  ;;  %vm1516_vm5 = vweird.f32 %v1937_v45 }
 0x752   : > { %vm1517_vm1 = vmor %vm1515_vm7, %vm1516_vm5 }
 0x753   : > { %v1511_v15 = vmul.f32 %v1937_v45, %v1510_v48 }
 0x755   : > { %v1512_v44 = vmul.f32 0.5, %v1511_v15 }
 0x757   : > { %v1513_v50 = vsub.f32 1.5, %v1512_v44 }
 0x759   : > { %v1514_v51 = vmul.f32 %v1937_v45, %v1513_v50 }
 0x75b   : > { %v1518_v16 = vsel %vm1517_vm1, %v1937_v45, %v1514_v51 }
 0x75c   : > { %v1519_v17 = vmul.f32 %v1518_v16, %v1502_v52 }
 0x75e   : > { %v1523_v19 = vmul.f32 %v1904_v8, %v1519_v17 }
 0x760   : > { %v1527_v20 = vadd.f32 %v1905_v18, %v1523_v19 }
 0x762   : > { %v1528_v21 = vpack.c.bf16 %v1527_v20, %v1527_v20 }
 0x764   : > { %1773 = vmatmul.msk.bf16.vlgmr.msra.gmra.mxu2 %vm440_vm0, %v1528_v21 }
 0x7e7   : > { %v1561_v29 = vpop.f32.mrf.mxu2 }
 0x7e8   : > { %v1562_v30 = vadd.f32 %v1906_v28, %v1561_v29 }
 0x7ea   : > { %v1566_v32 = vmul.f32 0.044715, %v1562_v30  ;;  %v1565_v49 = vmul.f32 0.5, %v1562_v30 }
 0x7ec   : > { %v1567_v33 = vmul.f32 %v1566_v32, %v1562_v30 }
 0x7ee   : > { %v1568_v34 = vmul.f32 %v1567_v33, %v1562_v30 }
 0x7ef   : > { %v1563_v36 = vpop.f32.mrf.mxu2 }
 0x7f0   : > { %v1569_v37 = vadd.f32 %v1568_v34, %v1562_v30 }
 0x7f2   : > { %v1570_v39 = vmul.f32 0.7978846, %v1569_v37 }
 0x7f4   : > { %1938 = vtanh.f32 %v1570_v39 }
 0x7fa   : > { %v1939_v40 = vpop.eup %1938 }
 0x7fb   : > { %v1572_v22 = vadd.f32 1.0, %v1939_v40 }
 0x7fd   : > { %v1573_v42 = vmul.f32 %v1572_v22, %v1565_v49 }
 0x7ff   : > { %v1574_v43 = vpack.c.bf16 %v1573_v42, %v1573_v42 }
 0x801   : > { %1651 = vmatmul.bf16.vlgmr.msra.gmra.mxu3 %v1574_v43 }
 0x884   : > { %v1652_v47 = vpop.f32.mrf.mxu3 }
 0x885   : > { %v1653_v54 = vadd.f32 %v1907_v41, %v1652_v47 }
 0x887   : > { %v1656_v56 = vadd.f32 %v1653_v54, %v2527_v4 }
 0x889   : > { %1657 = vst.msk [vmem:[%s431_s15] sm:$0xff] %vm440_vm0, %v1656_v56 }
 0x88a   : > { %1968 = shalt.err (!%p1965_p3)
}
 0x88b   : > { %1824 = dma.vmem_to_hbm [thread:$0]  (%p2127_p5), %s1672_s16, 128, %s1674_s2, %s1659_s29  }
 0x88c   : > { %v1654_v58 = vpop.f32.mrf.mxu3 }
 0x88d PF: > { %p1830_p4 = scmp.ge.s32.totalorder %s2003_s28, 2  ;;  %s1685_s0 = sand.u32 1, %s1991_s25  }
 0x88e   : > { %s1686_s30 = scalar_lea.sflag [#allocation9], %s1685_s0 }
 0x88f   : > { %p1827_p7 = pnand %p1830_p4, %p2131_p6 }
 0x891   : > { %p1828_p8 = pneg %p1827_p7 }
 0x893   : > { %1986 = dma.done.wait (%p1828_p8), %s1686_s30, 128  }
 0x894   : > { %1988 = vsyncadd (%p1828_p8), %s1686_s30, 4294967168  ;;  %p23_p9 = scmp.ge.s32.totalorder %s2114_s14, 4   ;;  %s2642_s25 = smov %s1995_s26 }
 0x895   : > { %s2643_s26 = smov %s1999_s27  ;;  %s2644_s27 = smov %s2125_s17 }
 0x896   : > { %s2645_s28 = smov %s2114_s14  ;;  %25 = sbr.rel (!%p23_p9) target bundleno = 8 (0x8), region = 107 }
 0x89b   :  { %1692 = vsyncpa [#allocation9], 1 }
 0x89c   :  { %1694 = vsyncpa [#allocation9 + $0x1], 1 }

</bundles_post_ra>
